<compile_context>
chip_gen: v5e
topology: v5e:2x2
jax: 0.10.0
libtpu: 0.0.40
codegen_flags: <defaults>
</compile_context>

<pallas_src>
import functools

import jax
import jax.numpy as jnp
from jax.experimental import pallas as pl
from jax.experimental.pallas import tpu as pltpu

EPS = 1e-5  # BatchNorm2d / InstanceNorm2d default eps


def _branch_body(f_ref, ft_ref, wt_ref, b_ref, g_ref, be_ref, o_ref, *, T, bn_c):
    """One Attn branch, layout [N, C, H*W] (H*W on lanes).

    f_ref  : (N*T, C, HW)   student features
    ft_ref : (N,   C, HW)   teacher features (shared across T)
    wt_ref : (Cout, 2C)     transposed 1x1 conv weight
    b_ref, g_ref, be_ref : (Cout, 1)  bias / gamma / beta (gamma=1, beta=0 on
                                       the InstanceNorm half)
    o_ref  : (N*T, Cout, HW)
    """
    NT = f_ref.shape[0]
    wt = wt_ref[...]                      # (Cout, 2C)
    bias = b_ref[...]                     # (Cout, 1)
    Cout = wt.shape[0]

    in_means, in_vars = [], []
    # Pass 1: conv (single K=2C matmul) + per-sample InstanceNorm stats.
    # Pre-norm activations are stashed in o_ref (f32 output doubles as scratch).
    for n in range(NT):
        x2 = jnp.concatenate([f_ref[n], ft_ref[n // T]], axis=0)         # (2C, HW)
        y = jnp.dot(wt, x2, preferred_element_type=jnp.float32) + bias    # (Cout, HW)
        m = jnp.mean(y, axis=1, keepdims=True)                            # (Cout, 1)
        v = jnp.mean(jnp.square(y - m), axis=1, keepdims=True)            # (Cout, 1)
        in_means.append(m)
        in_vars.append(v)
        o_ref[n] = y

    # BatchNorm (training-mode) stats folded from the InstanceNorm stats:
    #   bn_mean = E_n[in_mean];  bn_var = E_n[in_var + in_mean^2] - bn_mean^2
    inv_nt = 1.0 / NT
    bn_mean = sum(in_means) * inv_nt
    bn_ex2 = sum(v + jnp.square(m) for m, v in zip(in_means, in_vars)) * inv_nt
    bn_var = bn_ex2 - jnp.square(bn_mean)

    c_idx = jax.lax.broadcasted_iota(jnp.int32, (Cout, 1), 0)
    is_bn = c_idx < bn_c
    gamma = g_ref[...]                    # (Cout, 1)
    beta = be_ref[...]                    # (Cout, 1)

    # Pass 2: normalize + affine + ReLU.
    for n in range(NT):
        mean = jnp.where(is_bn, bn_mean, in_means[n])
        var = jnp.where(is_bn, bn_var, in_vars[n])
        scale = gamma * jax.lax.rsqrt(var + EPS)
        shift = beta - mean * scale
        o_ref[n] = jnp.maximum(o_ref[n] * scale + shift, 0.0)


def _fused_attn_kernel(*refs, T, bn_channels):
    nb = len(bn_channels)
    in_refs = refs[:6 * nb]
    out_refs = refs[6 * nb:]
    for i in range(nb):
        f_ref, ft_ref, wt_ref, b_ref, g_ref, be_ref = in_refs[6 * i:6 * (i + 1)]
        _branch_body(f_ref, ft_ref, wt_ref, b_ref, g_ref, be_ref, out_refs[i],
                     T=T, bn_c=bn_channels[i])


def _fused_attn(params, fs, fts, T):
    """Run all four branches in one pallas_call.

    fs[i]  : (N*T, C_i, H_i, W_i)  student features (NCHW)
    fts[i] : (N,   C_i, H_i, W_i)  teacher features (NOT repeated over T)
    """
    inputs = []
    out_shapes = []
    bn_channels = []
    for (wt, b, gamma, beta), f, ft in zip(params, fs, fts):
        NT, C, H, W = f.shape
        Nt = ft.shape[0]
        Cout = wt.shape[0]
        # NCHW -> (N, C, H*W): free reshape, channels on sublanes, H*W on lanes.
        inputs += [f.reshape(NT, C, H * W), ft.reshape(Nt, C, H * W),
                   wt, b, gamma, beta]
        out_shapes.append(jax.ShapeDtypeStruct((NT, Cout, H * W), jnp.float32))
        bn_channels.append(Cout // 2)

    kernel = functools.partial(_fused_attn_kernel, T=T,
                               bn_channels=tuple(bn_channels))
    outs = pl.pallas_call(
        kernel,
        out_shape=tuple(out_shapes),
        in_specs=[pl.BlockSpec(memory_space=pltpu.MemorySpace.VMEM)
                  for _ in inputs],
        out_specs=tuple(pl.BlockSpec(memory_space=pltpu.MemorySpace.VMEM)
                        for _ in out_shapes),
        compiler_params=pltpu.CompilerParams(
            vmem_limit_bytes=32 * 1024 * 1024),
    )(*inputs)

    return tuple(o.reshape(f.shape[0], o.shape[1], f.shape[2], f.shape[3])
                 for o, f in zip(outs, fs))


def init_attn_params(key, out_channels):
    """Kernel-ready per-branch params: (w_t, bias, gamma_full, beta_full).

    w_t        : (Cout, 2*Cout) transposed 1x1 conv weight
    bias       : (Cout, 1)
    gamma_full : (Cout, 1) BN affine weight on first Cout//2 channels, 1.0 on
                 the InstanceNorm half (no affine)
    beta_full  : (Cout, 1) BN affine bias, 0.0 on the InstanceNorm half
    (All slicing/concat/reshape done here, hoisted out of the forward path.)
    """
    params = []
    for c in out_channels:
        key, k_w, k_b, k_g, k_be = jax.random.split(key, 5)
        w_t = jax.random.normal(k_w, (c, 2 * c), jnp.float32) * 0.1
        b = jax.random.normal(k_b, (c, 1), jnp.float32) * 0.1
        bn_c = c // 2
        # PyTorch init is gamma=1 / beta=0; perturb BN affine for test coverage.
        gamma_bn = 1.0 + 0.1 * jax.random.normal(k_g, (bn_c, 1), jnp.float32)
        beta_bn = 0.1 * jax.random.normal(k_be, (bn_c, 1), jnp.float32)
        gamma = jnp.concatenate(
            [gamma_bn, jnp.ones((c - bn_c, 1), jnp.float32)], axis=0)
        beta = jnp.concatenate(
            [beta_bn, jnp.zeros((c - bn_c, 1), jnp.float32)], axis=0)
        params.append((w_t, b, gamma, beta))
    return params


def attn_forward(params, f1, f2, f3, f4, f1_t, f2_t, f3_t, f4_t):
    fs = (f1, f2, f3, f4)
    fts = (f1_t, f2_t, f3_t, f4_t)
    if f1.ndim == 5:
        # Time-series path: flatten (B, T) on the student features only; the
        # teacher features are reused per-t inside the kernel (no HBM repeat).
        B, T = f1.shape[:2]
        flat = [x.reshape((B * T,) + x.shape[2:]) for x in fs]
        outs = _fused_attn(params, flat, list(fts), T)
        return tuple(o.reshape((B, T) + o.shape[1:]) for o in outs)
    return _fused_attn(params, list(fs), list(fts), 1)


# ------------------------- pure-JAX reference -------------------------------
def _ref_branch(f, ft, wt, b, gamma, beta):
    N, C, H, W = f.shape
    Cout = wt.shape[0]
    bn_c = Cout // 2
    x = jnp.concatenate([f, ft], axis=1)                               # (N,2C,H,W)
    y = jnp.einsum('oc,nchw->nohw', wt, x,
                   precision=jax.lax.Precision.HIGHEST) + b.reshape(1, Cout, 1, 1)
    yb, yi = y[:, :bn_c], y[:, bn_c:]
    bm = jnp.mean(yb, axis=(0, 2, 3), keepdims=True)
    bv = jnp.mean(jnp.square(yb - bm), axis=(0, 2, 3), keepdims=True)
    g = gamma[:bn_c].reshape(1, bn_c, 1, 1)
    be = beta[:bn_c].reshape(1, bn_c, 1, 1)
    yb = (yb - bm) * g * jax.lax.rsqrt(bv + EPS) + be
    im = jnp.mean(yi, axis=(2, 3), keepdims=True)
    iv = jnp.mean(jnp.square(yi - im), axis=(2, 3), keepdims=True)
    yi = (yi - im) * jax.lax.rsqrt(iv + EPS)
    return jnp.maximum(jnp.concatenate([yb, yi], axis=1), 0.0)


if __name__ == "__main__":
    key = jax.random.PRNGKey(0)
    out_channels = [4, 8, 16, 32]
    spatial = [16, 8, 4, 2]
    N = 2

    key, pkey = jax.random.split(key)
    params = init_attn_params(pkey, out_channels)

    # ---- single-frame path ----
    feats, feats_t = [], []
    for c, s in zip(out_channels, spatial):
        key, k1, k2 = jax.random.split(key, 3)
        feats.append(jax.random.normal(k1, (N, c, s, s), jnp.float32))
        feats_t.append(jax.random.normal(k2, (N, c, s, s), jnp.float32))

    outs = jax.block_until_ready(attn_forward(params, *feats, *feats_t))

    for o, f, ft, p, c, s in zip(outs, feats, feats_t, params,
                                 out_channels, spatial):
        assert o.shape == (N, c, s, s), o.shape
        assert bool(jnp.all(o >= 0.0)), "ReLU violated"
        ref = _ref_branch(f, ft, *p)
        assert bool(jnp.allclose(o, ref, atol=2e-2, rtol=2e-2)), \
            float(jnp.max(jnp.abs(o - ref)))

    # ---- time-series path (teacher features are NOT repeated in HBM) ----
    B, T = 2, 3
    feats5, feats_t4 = [], []
    for c, s in zip(out_channels, spatial):
        key, k1, k2 = jax.random.split(key, 3)
        feats5.append(jax.random.normal(k1, (B, T, c, s, s), jnp.float32))
        feats_t4.append(jax.random.normal(k2, (B, c, s, s), jnp.float32))

    outs5 = jax.block_until_ready(attn_forward(params, *feats5, *feats_t4))

    for o, f, ft, p, c, s in zip(outs5, feats5, feats_t4, params,
                                 out_channels, spatial):
        assert o.shape == (B, T, c, s, s), o.shape
        f_flat = f.reshape(B * T, c, s, s)
        ft_rep = jnp.repeat(ft[:, None], T, axis=1).reshape(B * T, c, s, s)
        ref = _ref_branch(f_flat, ft_rep, *p).reshape(B, T, c, s, s)
        assert bool(jnp.allclose(o, ref, atol=2e-2, rtol=2e-2)), \
            float(jnp.max(jnp.abs(o - ref)))

    print("KERNEL_OK")
</pallas_src>

<mosaic_0001>
module attributes {stable_mosaic.version = 11 : i64} {
  func.func @_fused_attn_kernel(%arg0: memref<2x4x256xf32, #tpu.memory_space<vmem>>, %arg1: memref<2x4x256xf32, #tpu.memory_space<vmem>>, %arg2: memref<4x8xf32, #tpu.memory_space<vmem>>, %arg3: memref<4x1xf32, #tpu.memory_space<vmem>>, %arg4: memref<4x1xf32, #tpu.memory_space<vmem>>, %arg5: memref<4x1xf32, #tpu.memory_space<vmem>>, %arg6: memref<2x8x64xf32, #tpu.memory_space<vmem>>, %arg7: memref<2x8x64xf32, #tpu.memory_space<vmem>>, %arg8: memref<8x16xf32, #tpu.memory_space<vmem>>, %arg9: memref<8x1xf32, #tpu.memory_space<vmem>>, %arg10: memref<8x1xf32, #tpu.memory_space<vmem>>, %arg11: memref<8x1xf32, #tpu.memory_space<vmem>>, %arg12: memref<2x16x16xf32, #tpu.memory_space<vmem>>, %arg13: memref<2x16x16xf32, #tpu.memory_space<vmem>>, %arg14: memref<16x32xf32, #tpu.memory_space<vmem>>, %arg15: memref<16x1xf32, #tpu.memory_space<vmem>>, %arg16: memref<16x1xf32, #tpu.memory_space<vmem>>, %arg17: memref<16x1xf32, #tpu.memory_space<vmem>>, %arg18: memref<2x32x4xf32, #tpu.memory_space<vmem>>, %arg19: memref<2x32x4xf32, #tpu.memory_space<vmem>>, %arg20: memref<32x64xf32, #tpu.memory_space<vmem>>, %arg21: memref<32x1xf32, #tpu.memory_space<vmem>>, %arg22: memref<32x1xf32, #tpu.memory_space<vmem>>, %arg23: memref<32x1xf32, #tpu.memory_space<vmem>>, %arg24: memref<2x4x256xf32, #tpu.memory_space<vmem>>, %arg25: memref<2x8x64xf32, #tpu.memory_space<vmem>>, %arg26: memref<2x16x16xf32, #tpu.memory_space<vmem>>, %arg27: memref<2x32x4xf32, #tpu.memory_space<vmem>>) attributes {dimension_semantics = [], scalar_prefetch = 0 : i64, scratch_operands = 0 : i64, tpu.core_type = #tpu.core_type<tc>} {
    %c0 = arith.constant 0 : index
    %c0_0 = arith.constant 0 : index
    %0 = vector.load %arg2[%c0, %c0_0] : memref<4x8xf32, #tpu.memory_space<vmem>>, vector<4x8xf32>
    %c0_1 = arith.constant 0 : index
    %c0_2 = arith.constant 0 : index
    %1 = vector.load %arg3[%c0_1, %c0_2] : memref<4x1xf32, #tpu.memory_space<vmem>>, vector<4x1xf32>
    %c0_3 = arith.constant 0 : index
    %c0_4 = arith.constant 0 : index
    %c0_5 = arith.constant 0 : index
    %2 = vector.load %arg0[%c0_3, %c0_4, %c0_5] : memref<2x4x256xf32, #tpu.memory_space<vmem>>, vector<1x4x256xf32>
    %3 = vector.shape_cast %2 : vector<1x4x256xf32> to vector<4x256xf32>
    %c0_6 = arith.constant 0 : index
    %c0_7 = arith.constant 0 : index
    %c0_8 = arith.constant 0 : index
    %4 = vector.load %arg1[%c0_6, %c0_7, %c0_8] : memref<2x4x256xf32, #tpu.memory_space<vmem>>, vector<1x4x256xf32>
    %5 = vector.shape_cast %4 : vector<1x4x256xf32> to vector<4x256xf32>
    %6 = tpu.concatenate %3, %5 in 0 : vector<4x256xf32>, vector<4x256xf32> -> vector<8x256xf32>
    %cst = arith.constant dense<0.000000e+00> : vector<4x256xf32>
    %7 = tpu.matmul %0, %6, %cst {dimension_numbers = #tpu.dot_dimension_numbers<[1], [0], [0], [1], [0, 0, 1, 1], [], []>} : vector<4x8xf32>, vector<8x256xf32>, vector<4x256xf32> -> vector<4x256xf32>
    %8 = vector.broadcast %1 : vector<4x1xf32> to vector<4x256xf32>
    %9 = arith.addf %7, %8 : vector<4x256xf32>
    %cst_9 = arith.constant dense<0.000000e+00> : vector<4xf32>
    %10 = vector.multi_reduction <add>, %9, %cst_9 [1] : vector<4x256xf32> to vector<4xf32>
    %11 = vector.shape_cast %10 : vector<4xf32> to vector<4x1xf32>
    %cst_10 = arith.constant 2.560000e+02 : f32
    %12 = vector.broadcast %cst_10 : f32 to vector<4x1xf32>
    %13 = arith.divf %11, %12 : vector<4x1xf32>
    %14 = vector.broadcast %13 : vector<4x1xf32> to vector<4x256xf32>
    %15 = arith.subf %9, %14 : vector<4x256xf32>
    %16 = arith.mulf %15, %15 : vector<4x256xf32>
    %cst_11 = arith.constant dense<0.000000e+00> : vector<4xf32>
    %17 = vector.multi_reduction <add>, %16, %cst_11 [1] : vector<4x256xf32> to vector<4xf32>
    %18 = vector.shape_cast %17 : vector<4xf32> to vector<4x1xf32>
    %cst_12 = arith.constant 2.560000e+02 : f32
    %19 = vector.broadcast %cst_12 : f32 to vector<4x1xf32>
    %20 = arith.divf %18, %19 : vector<4x1xf32>
    %c0_13 = arith.constant 0 : index
    %c0_14 = arith.constant 0 : index
    %c0_15 = arith.constant 0 : index
    %21 = vector.load %arg24[%c0_13, %c0_14, %c0_15] : memref<2x4x256xf32, #tpu.memory_space<vmem>>, vector<1x4x256xf32>
    %22 = vector.shape_cast %21 : vector<1x4x256xf32> to vector<4x256xf32>
    %23 = vector.shape_cast %9 : vector<4x256xf32> to vector<1x4x256xf32>
    tpu.vector_store %arg24[%c0_13, %c0_14, %c0_15], %23 {strides = array<i32>} : memref<2x4x256xf32, #tpu.memory_space<vmem>>, vector<1x4x256xf32>,
    %c1 = arith.constant 1 : index
    %c0_16 = arith.constant 0 : index
    %c0_17 = arith.constant 0 : index
    %24 = vector.load %arg0[%c1, %c0_16, %c0_17] : memref<2x4x256xf32, #tpu.memory_space<vmem>>, vector<1x4x256xf32>
    %25 = vector.shape_cast %24 : vector<1x4x256xf32> to vector<4x256xf32>
    %c1_18 = arith.constant 1 : index
    %c0_19 = arith.constant 0 : index
    %c0_20 = arith.constant 0 : index
    %26 = vector.load %arg1[%c1_18, %c0_19, %c0_20] : memref<2x4x256xf32, #tpu.memory_space<vmem>>, vector<1x4x256xf32>
    %27 = vector.shape_cast %26 : vector<1x4x256xf32> to vector<4x256xf32>
    %28 = tpu.concatenate %25, %27 in 0 : vector<4x256xf32>, vector<4x256xf32> -> vector<8x256xf32>
    %cst_21 = arith.constant dense<0.000000e+00> : vector<4x256xf32>
    %29 = tpu.matmul %0, %28, %cst_21 {dimension_numbers = #tpu.dot_dimension_numbers<[1], [0], [0], [1], [0, 0, 1, 1], [], []>} : vector<4x8xf32>, vector<8x256xf32>, vector<4x256xf32> -> vector<4x256xf32>
    %30 = vector.broadcast %1 : vector<4x1xf32> to vector<4x256xf32>
    %31 = arith.addf %29, %30 : vector<4x256xf32>
    %cst_22 = arith.constant dense<0.000000e+00> : vector<4xf32>
    %32 = vector.multi_reduction <add>, %31, %cst_22 [1] : vector<4x256xf32> to vector<4xf32>
    %33 = vector.shape_cast %32 : vector<4xf32> to vector<4x1xf32>
    %cst_23 = arith.constant 2.560000e+02 : f32
    %34 = vector.broadcast %cst_23 : f32 to vector<4x1xf32>
    %35 = arith.divf %33, %34 : vector<4x1xf32>
    %36 = vector.broadcast %35 : vector<4x1xf32> to vector<4x256xf32>
    %37 = arith.subf %31, %36 : vector<4x256xf32>
    %38 = arith.mulf %37, %37 : vector<4x256xf32>
    %cst_24 = arith.constant dense<0.000000e+00> : vector<4xf32>
    %39 = vector.multi_reduction <add>, %38, %cst_24 [1] : vector<4x256xf32> to vector<4xf32>
    %40 = vector.shape_cast %39 : vector<4xf32> to vector<4x1xf32>
    %cst_25 = arith.constant 2.560000e+02 : f32
    %41 = vector.broadcast %cst_25 : f32 to vector<4x1xf32>
    %42 = arith.divf %40, %41 : vector<4x1xf32>
    %c1_26 = arith.constant 1 : index
    %c0_27 = arith.constant 0 : index
    %c0_28 = arith.constant 0 : index
    %43 = vector.load %arg24[%c1_26, %c0_27, %c0_28] : memref<2x4x256xf32, #tpu.memory_space<vmem>>, vector<1x4x256xf32>
    %44 = vector.shape_cast %43 : vector<1x4x256xf32> to vector<4x256xf32>
    %45 = vector.shape_cast %31 : vector<4x256xf32> to vector<1x4x256xf32>
    tpu.vector_store %arg24[%c1_26, %c0_27, %c0_28], %45 {strides = array<i32>} : memref<2x4x256xf32, #tpu.memory_space<vmem>>, vector<1x4x256xf32>,
    %cst_29 = arith.constant 0.000000e+00 : f32
    %46 = vector.broadcast %cst_29 : f32 to vector<4x1xf32>
    %47 = arith.addf %46, %13 : vector<4x1xf32>
    %48 = arith.addf %47, %35 : vector<4x1xf32>
    %cst_30 = arith.constant 5.000000e-01 : f32
    %49 = vector.broadcast %cst_30 : f32 to vector<4x1xf32>
    %50 = arith.mulf %48, %49 : vector<4x1xf32>
    %51 = arith.mulf %13, %13 : vector<4x1xf32>
    %52 = arith.addf %20, %51 : vector<4x1xf32>
    %cst_31 = arith.constant 0.000000e+00 : f32
    %53 = vector.broadcast %cst_31 : f32 to vector<4x1xf32>
    %54 = arith.addf %53, %52 : vector<4x1xf32>
    %55 = arith.mulf %35, %35 : vector<4x1xf32>
    %56 = arith.addf %42, %55 : vector<4x1xf32>
    %57 = arith.addf %54, %56 : vector<4x1xf32>
    %cst_32 = arith.constant 5.000000e-01 : f32
    %58 = vector.broadcast %cst_32 : f32 to vector<4x1xf32>
    %59 = arith.mulf %57, %58 : vector<4x1xf32>
    %60 = arith.mulf %50, %50 : vector<4x1xf32>
    %61 = arith.subf %59, %60 : vector<4x1xf32>
    %62 = tpu.iota {dimensions = array<i32: 0>} : vector<4x1xi32>
    %c2_i32 = arith.constant 2 : i32
    %63 = vector.broadcast %c2_i32 : i32 to vector<4x1xi32>
    %64 = arith.cmpi slt, %62, %63 : vector<4x1xi32>
    %c0_33 = arith.constant 0 : index
    %c0_34 = arith.constant 0 : index
    %65 = vector.load %arg4[%c0_33, %c0_34] : memref<4x1xf32, #tpu.memory_space<vmem>>, vector<4x1xf32>
    %c0_35 = arith.constant 0 : index
    %c0_36 = arith.constant 0 : index
    %66 = vector.load %arg5[%c0_35, %c0_36] : memref<4x1xf32, #tpu.memory_space<vmem>>, vector<4x1xf32>
    %67 = arith.select %64, %50, %13 : vector<4x1xi1>, vector<4x1xf32>
    %68 = arith.select %64, %61, %20 : vector<4x1xi1>, vector<4x1xf32>
    %cst_37 = arith.constant 9.99999974E-6 : f32
    %69 = vector.broadcast %cst_37 : f32 to vector<4x1xf32>
    %70 = arith.addf %68, %69 : vector<4x1xf32>
    %71 = math.rsqrt %70 : vector<4x1xf32>
    %72 = arith.mulf %65, %71 : vector<4x1xf32>
    %73 = arith.mulf %67, %72 : vector<4x1xf32>
    %74 = arith.subf %66, %73 : vector<4x1xf32>
    %c0_38 = arith.constant 0 : index
    %c0_39 = arith.constant 0 : index
    %c0_40 = arith.constant 0 : index
    %75 = vector.load %arg24[%c0_38, %c0_39, %c0_40] : memref<2x4x256xf32, #tpu.memory_space<vmem>>, vector<1x4x256xf32>
    %76 = vector.shape_cast %75 : vector<1x4x256xf32> to vector<4x256xf32>
    %77 = vector.broadcast %72 : vector<4x1xf32> to vector<4x256xf32>
    %78 = arith.mulf %76, %77 : vector<4x256xf32>
    %79 = vector.broadcast %74 : vector<4x1xf32> to vector<4x256xf32>
    %80 = arith.addf %78, %79 : vector<4x256xf32>
    %cst_41 = arith.constant 0.000000e+00 : f32
    %81 = vector.broadcast %cst_41 : f32 to vector<4x256xf32>
    %82 = arith.maximumf %80, %81 : vector<4x256xf32>
    %c0_42 = arith.constant 0 : index
    %c0_43 = arith.constant 0 : index
    %c0_44 = arith.constant 0 : index
    %83 = vector.load %arg24[%c0_42, %c0_43, %c0_44] : memref<2x4x256xf32, #tpu.memory_space<vmem>>, vector<1x4x256xf32>
    %84 = vector.shape_cast %83 : vector<1x4x256xf32> to vector<4x256xf32>
    %85 = vector.shape_cast %82 : vector<4x256xf32> to vector<1x4x256xf32>
    tpu.vector_store %arg24[%c0_42, %c0_43, %c0_44], %85 {strides = array<i32>} : memref<2x4x256xf32, #tpu.memory_space<vmem>>, vector<1x4x256xf32>,
    %86 = arith.select %64, %50, %35 : vector<4x1xi1>, vector<4x1xf32>
    %87 = arith.select %64, %61, %42 : vector<4x1xi1>, vector<4x1xf32>
    %cst_45 = arith.constant 9.99999974E-6 : f32
    %88 = vector.broadcast %cst_45 : f32 to vector<4x1xf32>
    %89 = arith.addf %87, %88 : vector<4x1xf32>
    %90 = math.rsqrt %89 : vector<4x1xf32>
    %91 = arith.mulf %65, %90 : vector<4x1xf32>
    %92 = arith.mulf %86, %91 : vector<4x1xf32>
    %93 = arith.subf %66, %92 : vector<4x1xf32>
    %c1_46 = arith.constant 1 : index
    %c0_47 = arith.constant 0 : index
    %c0_48 = arith.constant 0 : index
    %94 = vector.load %arg24[%c1_46, %c0_47, %c0_48] : memref<2x4x256xf32, #tpu.memory_space<vmem>>, vector<1x4x256xf32>
    %95 = vector.shape_cast %94 : vector<1x4x256xf32> to vector<4x256xf32>
    %96 = vector.broadcast %91 : vector<4x1xf32> to vector<4x256xf32>
    %97 = arith.mulf %95, %96 : vector<4x256xf32>
    %98 = vector.broadcast %93 : vector<4x1xf32> to vector<4x256xf32>
    %99 = arith.addf %97, %98 : vector<4x256xf32>
    %cst_49 = arith.constant 0.000000e+00 : f32
    %100 = vector.broadcast %cst_49 : f32 to vector<4x256xf32>
    %101 = arith.maximumf %99, %100 : vector<4x256xf32>
    %c1_50 = arith.constant 1 : index
    %c0_51 = arith.constant 0 : index
    %c0_52 = arith.constant 0 : index
    %102 = vector.load %arg24[%c1_50, %c0_51, %c0_52] : memref<2x4x256xf32, #tpu.memory_space<vmem>>, vector<1x4x256xf32>
    %103 = vector.shape_cast %102 : vector<1x4x256xf32> to vector<4x256xf32>
    %104 = vector.shape_cast %101 : vector<4x256xf32> to vector<1x4x256xf32>
    tpu.vector_store %arg24[%c1_50, %c0_51, %c0_52], %104 {strides = array<i32>} : memref<2x4x256xf32, #tpu.memory_space<vmem>>, vector<1x4x256xf32>,
    %c0_53 = arith.constant 0 : index
    %c0_54 = arith.constant 0 : index
    %105 = vector.load %arg8[%c0_53, %c0_54] : memref<8x16xf32, #tpu.memory_space<vmem>>, vector<8x16xf32>
    %c0_55 = arith.constant 0 : index
    %c0_56 = arith.constant 0 : index
    %106 = vector.load %arg9[%c0_55, %c0_56] : memref<8x1xf32, #tpu.memory_space<vmem>>, vector<8x1xf32>
    %c0_57 = arith.constant 0 : index
    %c0_58 = arith.constant 0 : index
    %c0_59 = arith.constant 0 : index
    %107 = vector.load %arg6[%c0_57, %c0_58, %c0_59] : memref<2x8x64xf32, #tpu.memory_space<vmem>>, vector<1x8x64xf32>
    %108 = vector.shape_cast %107 : vector<1x8x64xf32> to vector<8x64xf32>
    %c0_60 = arith.constant 0 : index
    %c0_61 = arith.constant 0 : index
    %c0_62 = arith.constant 0 : index
    %109 = vector.load %arg7[%c0_60, %c0_61, %c0_62] : memref<2x8x64xf32, #tpu.memory_space<vmem>>, vector<1x8x64xf32>
    %110 = vector.shape_cast %109 : vector<1x8x64xf32> to vector<8x64xf32>
    %111 = tpu.concatenate %108, %110 in 0 : vector<8x64xf32>, vector<8x64xf32> -> vector<16x64xf32>
    %cst_63 = arith.constant dense<0.000000e+00> : vector<8x64xf32>
    %112 = tpu.matmul %105, %111, %cst_63 {dimension_numbers = #tpu.dot_dimension_numbers<[1], [0], [0], [1], [0, 0, 1, 1], [], []>} : vector<8x16xf32>, vector<16x64xf32>, vector<8x64xf32> -> vector<8x64xf32>
    %113 = vector.broadcast %106 : vector<8x1xf32> to vector<8x64xf32>
    %114 = arith.addf %112, %113 : vector<8x64xf32>
    %cst_64 = arith.constant dense<0.000000e+00> : vector<8xf32>
    %115 = vector.multi_reduction <add>, %114, %cst_64 [1] : vector<8x64xf32> to vector<8xf32>
    %116 = vector.shape_cast %115 : vector<8xf32> to vector<8x1xf32>
    %cst_65 = arith.constant 6.400000e+01 : f32
    %117 = vector.broadcast %cst_65 : f32 to vector<8x1xf32>
    %118 = arith.divf %116, %117 : vector<8x1xf32>
    %119 = vector.broadcast %118 : vector<8x1xf32> to vector<8x64xf32>
    %120 = arith.subf %114, %119 : vector<8x64xf32>
    %121 = arith.mulf %120, %120 : vector<8x64xf32>
    %cst_66 = arith.constant dense<0.000000e+00> : vector<8xf32>
    %122 = vector.multi_reduction <add>, %121, %cst_66 [1] : vector<8x64xf32> to vector<8xf32>
    %123 = vector.shape_cast %122 : vector<8xf32> to vector<8x1xf32>
    %cst_67 = arith.constant 6.400000e+01 : f32
    %124 = vector.broadcast %cst_67 : f32 to vector<8x1xf32>
    %125 = arith.divf %123, %124 : vector<8x1xf32>
    %c0_68 = arith.constant 0 : index
    %c0_69 = arith.constant 0 : index
    %c0_70 = arith.constant 0 : index
    %126 = vector.load %arg25[%c0_68, %c0_69, %c0_70] : memref<2x8x64xf32, #tpu.memory_space<vmem>>, vector<1x8x64xf32>
    %127 = vector.shape_cast %126 : vector<1x8x64xf32> to vector<8x64xf32>
    %128 = vector.shape_cast %114 : vector<8x64xf32> to vector<1x8x64xf32>
    tpu.vector_store %arg25[%c0_68, %c0_69, %c0_70], %128 {strides = array<i32>} : memref<2x8x64xf32, #tpu.memory_space<vmem>>, vector<1x8x64xf32>,
    %c1_71 = arith.constant 1 : index
    %c0_72 = arith.constant 0 : index
    %c0_73 = arith.constant 0 : index
    %129 = vector.load %arg6[%c1_71, %c0_72, %c0_73] : memref<2x8x64xf32, #tpu.memory_space<vmem>>, vector<1x8x64xf32>
    %130 = vector.shape_cast %129 : vector<1x8x64xf32> to vector<8x64xf32>
    %c1_74 = arith.constant 1 : index
    %c0_75 = arith.constant 0 : index
    %c0_76 = arith.constant 0 : index
    %131 = vector.load %arg7[%c1_74, %c0_75, %c0_76] : memref<2x8x64xf32, #tpu.memory_space<vmem>>, vector<1x8x64xf32>
    %132 = vector.shape_cast %131 : vector<1x8x64xf32> to vector<8x64xf32>
    %133 = tpu.concatenate %130, %132 in 0 : vector<8x64xf32>, vector<8x64xf32> -> vector<16x64xf32>
    %cst_77 = arith.constant dense<0.000000e+00> : vector<8x64xf32>
    %134 = tpu.matmul %105, %133, %cst_77 {dimension_numbers = #tpu.dot_dimension_numbers<[1], [0], [0], [1], [0, 0, 1, 1], [], []>} : vector<8x16xf32>, vector<16x64xf32>, vector<8x64xf32> -> vector<8x64xf32>
    %135 = vector.broadcast %106 : vector<8x1xf32> to vector<8x64xf32>
    %136 = arith.addf %134, %135 : vector<8x64xf32>
    %cst_78 = arith.constant dense<0.000000e+00> : vector<8xf32>
    %137 = vector.multi_reduction <add>, %136, %cst_78 [1] : vector<8x64xf32> to vector<8xf32>
    %138 = vector.shape_cast %137 : vector<8xf32> to vector<8x1xf32>
    %cst_79 = arith.constant 6.400000e+01 : f32
    %139 = vector.broadcast %cst_79 : f32 to vector<8x1xf32>
    %140 = arith.divf %138, %139 : vector<8x1xf32>
    %141 = vector.broadcast %140 : vector<8x1xf32> to vector<8x64xf32>
    %142 = arith.subf %136, %141 : vector<8x64xf32>
    %143 = arith.mulf %142, %142 : vector<8x64xf32>
    %cst_80 = arith.constant dense<0.000000e+00> : vector<8xf32>
    %144 = vector.multi_reduction <add>, %143, %cst_80 [1] : vector<8x64xf32> to vector<8xf32>
    %145 = vector.shape_cast %144 : vector<8xf32> to vector<8x1xf32>
    %cst_81 = arith.constant 6.400000e+01 : f32
    %146 = vector.broadcast %cst_81 : f32 to vector<8x1xf32>
    %147 = arith.divf %145, %146 : vector<8x1xf32>
    %c1_82 = arith.constant 1 : index
    %c0_83 = arith.constant 0 : index
    %c0_84 = arith.constant 0 : index
    %148 = vector.load %arg25[%c1_82, %c0_83, %c0_84] : memref<2x8x64xf32, #tpu.memory_space<vmem>>, vector<1x8x64xf32>
    %149 = vector.shape_cast %148 : vector<1x8x64xf32> to vector<8x64xf32>
    %150 = vector.shape_cast %136 : vector<8x64xf32> to vector<1x8x64xf32>
    tpu.vector_store %arg25[%c1_82, %c0_83, %c0_84], %150 {strides = array<i32>} : memref<2x8x64xf32, #tpu.memory_space<vmem>>, vector<1x8x64xf32>,
    %cst_85 = arith.constant 0.000000e+00 : f32
    %151 = vector.broadcast %cst_85 : f32 to vector<8x1xf32>
    %152 = arith.addf %151, %118 : vector<8x1xf32>
    %153 = arith.addf %152, %140 : vector<8x1xf32>
    %cst_86 = arith.constant 5.000000e-01 : f32
    %154 = vector.broadcast %cst_86 : f32 to vector<8x1xf32>
    %155 = arith.mulf %153, %154 : vector<8x1xf32>
    %156 = arith.mulf %118, %118 : vector<8x1xf32>
    %157 = arith.addf %125, %156 : vector<8x1xf32>
    %cst_87 = arith.constant 0.000000e+00 : f32
    %158 = vector.broadcast %cst_87 : f32 to vector<8x1xf32>
    %159 = arith.addf %158, %157 : vector<8x1xf32>
    %160 = arith.mulf %140, %140 : vector<8x1xf32>
    %161 = arith.addf %147, %160 : vector<8x1xf32>
    %162 = arith.addf %159, %161 : vector<8x1xf32>
    %cst_88 = arith.constant 5.000000e-01 : f32
    %163 = vector.broadcast %cst_88 : f32 to vector<8x1xf32>
    %164 = arith.mulf %162, %163 : vector<8x1xf32>
    %165 = arith.mulf %155, %155 : vector<8x1xf32>
    %166 = arith.subf %164, %165 : vector<8x1xf32>
    %167 = tpu.iota {dimensions = array<i32: 0>} : vector<8x1xi32>
    %c4_i32 = arith.constant 4 : i32
    %168 = vector.broadcast %c4_i32 : i32 to vector<8x1xi32>
    %169 = arith.cmpi slt, %167, %168 : vector<8x1xi32>
    %c0_89 = arith.constant 0 : index
    %c0_90 = arith.constant 0 : index
    %170 = vector.load %arg10[%c0_89, %c0_90] : memref<8x1xf32, #tpu.memory_space<vmem>>, vector<8x1xf32>
    %c0_91 = arith.constant 0 : index
    %c0_92 = arith.constant 0 : index
    %171 = vector.load %arg11[%c0_91, %c0_92] : memref<8x1xf32, #tpu.memory_space<vmem>>, vector<8x1xf32>
    %172 = arith.select %169, %155, %118 : vector<8x1xi1>, vector<8x1xf32>
    %173 = arith.select %169, %166, %125 : vector<8x1xi1>, vector<8x1xf32>
    %cst_93 = arith.constant 9.99999974E-6 : f32
    %174 = vector.broadcast %cst_93 : f32 to vector<8x1xf32>
    %175 = arith.addf %173, %174 : vector<8x1xf32>
    %176 = math.rsqrt %175 : vector<8x1xf32>
    %177 = arith.mulf %170, %176 : vector<8x1xf32>
    %178 = arith.mulf %172, %177 : vector<8x1xf32>
    %179 = arith.subf %171, %178 : vector<8x1xf32>
    %c0_94 = arith.constant 0 : index
    %c0_95 = arith.constant 0 : index
    %c0_96 = arith.constant 0 : index
    %180 = vector.load %arg25[%c0_94, %c0_95, %c0_96] : memref<2x8x64xf32, #tpu.memory_space<vmem>>, vector<1x8x64xf32>
    %181 = vector.shape_cast %180 : vector<1x8x64xf32> to vector<8x64xf32>
    %182 = vector.broadcast %177 : vector<8x1xf32> to vector<8x64xf32>
    %183 = arith.mulf %181, %182 : vector<8x64xf32>
    %184 = vector.broadcast %179 : vector<8x1xf32> to vector<8x64xf32>
    %185 = arith.addf %183, %184 : vector<8x64xf32>
    %cst_97 = arith.constant 0.000000e+00 : f32
    %186 = vector.broadcast %cst_97 : f32 to vector<8x64xf32>
    %187 = arith.maximumf %185, %186 : vector<8x64xf32>
    %c0_98 = arith.constant 0 : index
    %c0_99 = arith.constant 0 : index
    %c0_100 = arith.constant 0 : index
    %188 = vector.load %arg25[%c0_98, %c0_99, %c0_100] : memref<2x8x64xf32, #tpu.memory_space<vmem>>, vector<1x8x64xf32>
    %189 = vector.shape_cast %188 : vector<1x8x64xf32> to vector<8x64xf32>
    %190 = vector.shape_cast %187 : vector<8x64xf32> to vector<1x8x64xf32>
    tpu.vector_store %arg25[%c0_98, %c0_99, %c0_100], %190 {strides = array<i32>} : memref<2x8x64xf32, #tpu.memory_space<vmem>>, vector<1x8x64xf32>,
    %191 = arith.select %169, %155, %140 : vector<8x1xi1>, vector<8x1xf32>
    %192 = arith.select %169, %166, %147 : vector<8x1xi1>, vector<8x1xf32>
    %cst_101 = arith.constant 9.99999974E-6 : f32
    %193 = vector.broadcast %cst_101 : f32 to vector<8x1xf32>
    %194 = arith.addf %192, %193 : vector<8x1xf32>
    %195 = math.rsqrt %194 : vector<8x1xf32>
    %196 = arith.mulf %170, %195 : vector<8x1xf32>
    %197 = arith.mulf %191, %196 : vector<8x1xf32>
    %198 = arith.subf %171, %197 : vector<8x1xf32>
    %c1_102 = arith.constant 1 : index
    %c0_103 = arith.constant 0 : index
    %c0_104 = arith.constant 0 : index
    %199 = vector.load %arg25[%c1_102, %c0_103, %c0_104] : memref<2x8x64xf32, #tpu.memory_space<vmem>>, vector<1x8x64xf32>
    %200 = vector.shape_cast %199 : vector<1x8x64xf32> to vector<8x64xf32>
    %201 = vector.broadcast %196 : vector<8x1xf32> to vector<8x64xf32>
    %202 = arith.mulf %200, %201 : vector<8x64xf32>
    %203 = vector.broadcast %198 : vector<8x1xf32> to vector<8x64xf32>
    %204 = arith.addf %202, %203 : vector<8x64xf32>
    %cst_105 = arith.constant 0.000000e+00 : f32
    %205 = vector.broadcast %cst_105 : f32 to vector<8x64xf32>
    %206 = arith.maximumf %204, %205 : vector<8x64xf32>
    %c1_106 = arith.constant 1 : index
    %c0_107 = arith.constant 0 : index
    %c0_108 = arith.constant 0 : index
    %207 = vector.load %arg25[%c1_106, %c0_107, %c0_108] : memref<2x8x64xf32, #tpu.memory_space<vmem>>, vector<1x8x64xf32>
    %208 = vector.shape_cast %207 : vector<1x8x64xf32> to vector<8x64xf32>
    %209 = vector.shape_cast %206 : vector<8x64xf32> to vector<1x8x64xf32>
    tpu.vector_store %arg25[%c1_106, %c0_107, %c0_108], %209 {strides = array<i32>} : memref<2x8x64xf32, #tpu.memory_space<vmem>>, vector<1x8x64xf32>,
    %c0_109 = arith.constant 0 : index
    %c0_110 = arith.constant 0 : index
    %210 = vector.load %arg14[%c0_109, %c0_110] : memref<16x32xf32, #tpu.memory_space<vmem>>, vector<16x32xf32>
    %c0_111 = arith.constant 0 : index
    %c0_112 = arith.constant 0 : index
    %211 = vector.load %arg15[%c0_111, %c0_112] : memref<16x1xf32, #tpu.memory_space<vmem>>, vector<16x1xf32>
    %c0_113 = arith.constant 0 : index
    %c0_114 = arith.constant 0 : index
    %c0_115 = arith.constant 0 : index
    %212 = vector.load %arg12[%c0_113, %c0_114, %c0_115] : memref<2x16x16xf32, #tpu.memory_space<vmem>>, vector<1x16x16xf32>
    %213 = vector.shape_cast %212 : vector<1x16x16xf32> to vector<16x16xf32>
    %c0_116 = arith.constant 0 : index
    %c0_117 = arith.constant 0 : index
    %c0_118 = arith.constant 0 : index
    %214 = vector.load %arg13[%c0_116, %c0_117, %c0_118] : memref<2x16x16xf32, #tpu.memory_space<vmem>>, vector<1x16x16xf32>
    %215 = vector.shape_cast %214 : vector<1x16x16xf32> to vector<16x16xf32>
    %216 = tpu.concatenate %213, %215 in 0 : vector<16x16xf32>, vector<16x16xf32> -> vector<32x16xf32>
    %cst_119 = arith.constant dense<0.000000e+00> : vector<16x16xf32>
    %217 = tpu.matmul %210, %216, %cst_119 {dimension_numbers = #tpu.dot_dimension_numbers<[1], [0], [0], [1], [0, 0, 1, 1], [], []>} : vector<16x32xf32>, vector<32x16xf32>, vector<16x16xf32> -> vector<16x16xf32>
    %218 = vector.broadcast %211 : vector<16x1xf32> to vector<16x16xf32>
    %219 = arith.addf %217, %218 : vector<16x16xf32>
    %cst_120 = arith.constant dense<0.000000e+00> : vector<16xf32>
    %220 = vector.multi_reduction <add>, %219, %cst_120 [1] : vector<16x16xf32> to vector<16xf32>
    %221 = vector.shape_cast %220 : vector<16xf32> to vector<16x1xf32>
    %cst_121 = arith.constant 1.600000e+01 : f32
    %222 = vector.broadcast %cst_121 : f32 to vector<16x1xf32>
    %223 = arith.divf %221, %222 : vector<16x1xf32>
    %224 = vector.broadcast %223 : vector<16x1xf32> to vector<16x16xf32>
    %225 = arith.subf %219, %224 : vector<16x16xf32>
    %226 = arith.mulf %225, %225 : vector<16x16xf32>
    %cst_122 = arith.constant dense<0.000000e+00> : vector<16xf32>
    %227 = vector.multi_reduction <add>, %226, %cst_122 [1] : vector<16x16xf32> to vector<16xf32>
    %228 = vector.shape_cast %227 : vector<16xf32> to vector<16x1xf32>
    %cst_123 = arith.constant 1.600000e+01 : f32
    %229 = vector.broadcast %cst_123 : f32 to vector<16x1xf32>
    %230 = arith.divf %228, %229 : vector<16x1xf32>
    %c0_124 = arith.constant 0 : index
    %c0_125 = arith.constant 0 : index
    %c0_126 = arith.constant 0 : index
    %231 = vector.load %arg26[%c0_124, %c0_125, %c0_126] : memref<2x16x16xf32, #tpu.memory_space<vmem>>, vector<1x16x16xf32>
    %232 = vector.shape_cast %231 : vector<1x16x16xf32> to vector<16x16xf32>
    %233 = vector.shape_cast %219 : vector<16x16xf32> to vector<1x16x16xf32>
    tpu.vector_store %arg26[%c0_124, %c0_125, %c0_126], %233 {strides = array<i32>} : memref<2x16x16xf32, #tpu.memory_space<vmem>>, vector<1x16x16xf32>,
    %c1_127 = arith.constant 1 : index
    %c0_128 = arith.constant 0 : index
    %c0_129 = arith.constant 0 : index
    %234 = vector.load %arg12[%c1_127, %c0_128, %c0_129] : memref<2x16x16xf32, #tpu.memory_space<vmem>>, vector<1x16x16xf32>
    %235 = vector.shape_cast %234 : vector<1x16x16xf32> to vector<16x16xf32>
    %c1_130 = arith.constant 1 : index
    %c0_131 = arith.constant 0 : index
    %c0_132 = arith.constant 0 : index
    %236 = vector.load %arg13[%c1_130, %c0_131, %c0_132] : memref<2x16x16xf32, #tpu.memory_space<vmem>>, vector<1x16x16xf32>
    %237 = vector.shape_cast %236 : vector<1x16x16xf32> to vector<16x16xf32>
    %238 = tpu.concatenate %235, %237 in 0 : vector<16x16xf32>, vector<16x16xf32> -> vector<32x16xf32>
    %cst_133 = arith.constant dense<0.000000e+00> : vector<16x16xf32>
    %239 = tpu.matmul %210, %238, %cst_133 {dimension_numbers = #tpu.dot_dimension_numbers<[1], [0], [0], [1], [0, 0, 1, 1], [], []>} : vector<16x32xf32>, vector<32x16xf32>, vector<16x16xf32> -> vector<16x16xf32>
    %240 = vector.broadcast %211 : vector<16x1xf32> to vector<16x16xf32>
    %241 = arith.addf %239, %240 : vector<16x16xf32>
    %cst_134 = arith.constant dense<0.000000e+00> : vector<16xf32>
    %242 = vector.multi_reduction <add>, %241, %cst_134 [1] : vector<16x16xf32> to vector<16xf32>
    %243 = vector.shape_cast %242 : vector<16xf32> to vector<16x1xf32>
    %cst_135 = arith.constant 1.600000e+01 : f32
    %244 = vector.broadcast %cst_135 : f32 to vector<16x1xf32>
    %245 = arith.divf %243, %244 : vector<16x1xf32>
    %246 = vector.broadcast %245 : vector<16x1xf32> to vector<16x16xf32>
    %247 = arith.subf %241, %246 : vector<16x16xf32>
    %248 = arith.mulf %247, %247 : vector<16x16xf32>
    %cst_136 = arith.constant dense<0.000000e+00> : vector<16xf32>
    %249 = vector.multi_reduction <add>, %248, %cst_136 [1] : vector<16x16xf32> to vector<16xf32>
    %250 = vector.shape_cast %249 : vector<16xf32> to vector<16x1xf32>
    %cst_137 = arith.constant 1.600000e+01 : f32
    %251 = vector.broadcast %cst_137 : f32 to vector<16x1xf32>
    %252 = arith.divf %250, %251 : vector<16x1xf32>
    %c1_138 = arith.constant 1 : index
    %c0_139 = arith.constant 0 : index
    %c0_140 = arith.constant 0 : index
    %253 = vector.load %arg26[%c1_138, %c0_139, %c0_140] : memref<2x16x16xf32, #tpu.memory_space<vmem>>, vector<1x16x16xf32>
    %254 = vector.shape_cast %253 : vector<1x16x16xf32> to vector<16x16xf32>
    %255 = vector.shape_cast %241 : vector<16x16xf32> to vector<1x16x16xf32>
    tpu.vector_store %arg26[%c1_138, %c0_139, %c0_140], %255 {strides = array<i32>} : memref<2x16x16xf32, #tpu.memory_space<vmem>>, vector<1x16x16xf32>,
    %cst_141 = arith.constant 0.000000e+00 : f32
    %256 = vector.broadcast %cst_141 : f32 to vector<16x1xf32>
    %257 = arith.addf %256, %223 : vector<16x1xf32>
    %258 = arith.addf %257, %245 : vector<16x1xf32>
    %cst_142 = arith.constant 5.000000e-01 : f32
    %259 = vector.broadcast %cst_142 : f32 to vector<16x1xf32>
    %260 = arith.mulf %258, %259 : vector<16x1xf32>
    %261 = arith.mulf %223, %223 : vector<16x1xf32>
    %262 = arith.addf %230, %261 : vector<16x1xf32>
    %cst_143 = arith.constant 0.000000e+00 : f32
    %263 = vector.broadcast %cst_143 : f32 to vector<16x1xf32>
    %264 = arith.addf %263, %262 : vector<16x1xf32>
    %265 = arith.mulf %245, %245 : vector<16x1xf32>
    %266 = arith.addf %252, %265 : vector<16x1xf32>
    %267 = arith.addf %264, %266 : vector<16x1xf32>
    %cst_144 = arith.constant 5.000000e-01 : f32
    %268 = vector.broadcast %cst_144 : f32 to vector<16x1xf32>
    %269 = arith.mulf %267, %268 : vector<16x1xf32>
    %270 = arith.mulf %260, %260 : vector<16x1xf32>
    %271 = arith.subf %269, %270 : vector<16x1xf32>
    %272 = tpu.iota {dimensions = array<i32: 0>} : vector<16x1xi32>
    %c8_i32 = arith.constant 8 : i32
    %273 = vector.broadcast %c8_i32 : i32 to vector<16x1xi32>
    %274 = arith.cmpi slt, %272, %273 : vector<16x1xi32>
    %c0_145 = arith.constant 0 : index
    %c0_146 = arith.constant 0 : index
    %275 = vector.load %arg16[%c0_145, %c0_146] : memref<16x1xf32, #tpu.memory_space<vmem>>, vector<16x1xf32>
    %c0_147 = arith.constant 0 : index
    %c0_148 = arith.constant 0 : index
    %276 = vector.load %arg17[%c0_147, %c0_148] : memref<16x1xf32, #tpu.memory_space<vmem>>, vector<16x1xf32>
    %277 = arith.select %274, %260, %223 : vector<16x1xi1>, vector<16x1xf32>
    %278 = arith.select %274, %271, %230 : vector<16x1xi1>, vector<16x1xf32>
    %cst_149 = arith.constant 9.99999974E-6 : f32
    %279 = vector.broadcast %cst_149 : f32 to vector<16x1xf32>
    %280 = arith.addf %278, %279 : vector<16x1xf32>
    %281 = math.rsqrt %280 : vector<16x1xf32>
    %282 = arith.mulf %275, %281 : vector<16x1xf32>
    %283 = arith.mulf %277, %282 : vector<16x1xf32>
    %284 = arith.subf %276, %283 : vector<16x1xf32>
    %c0_150 = arith.constant 0 : index
    %c0_151 = arith.constant 0 : index
    %c0_152 = arith.constant 0 : index
    %285 = vector.load %arg26[%c0_150, %c0_151, %c0_152] : memref<2x16x16xf32, #tpu.memory_space<vmem>>, vector<1x16x16xf32>
    %286 = vector.shape_cast %285 : vector<1x16x16xf32> to vector<16x16xf32>
    %287 = vector.broadcast %282 : vector<16x1xf32> to vector<16x16xf32>
    %288 = arith.mulf %286, %287 : vector<16x16xf32>
    %289 = vector.broadcast %284 : vector<16x1xf32> to vector<16x16xf32>
    %290 = arith.addf %288, %289 : vector<16x16xf32>
    %cst_153 = arith.constant 0.000000e+00 : f32
    %291 = vector.broadcast %cst_153 : f32 to vector<16x16xf32>
    %292 = arith.maximumf %290, %291 : vector<16x16xf32>
    %c0_154 = arith.constant 0 : index
    %c0_155 = arith.constant 0 : index
    %c0_156 = arith.constant 0 : index
    %293 = vector.load %arg26[%c0_154, %c0_155, %c0_156] : memref<2x16x16xf32, #tpu.memory_space<vmem>>, vector<1x16x16xf32>
    %294 = vector.shape_cast %293 : vector<1x16x16xf32> to vector<16x16xf32>
    %295 = vector.shape_cast %292 : vector<16x16xf32> to vector<1x16x16xf32>
    tpu.vector_store %arg26[%c0_154, %c0_155, %c0_156], %295 {strides = array<i32>} : memref<2x16x16xf32, #tpu.memory_space<vmem>>, vector<1x16x16xf32>,
    %296 = arith.select %274, %260, %245 : vector<16x1xi1>, vector<16x1xf32>
    %297 = arith.select %274, %271, %252 : vector<16x1xi1>, vector<16x1xf32>
    %cst_157 = arith.constant 9.99999974E-6 : f32
    %298 = vector.broadcast %cst_157 : f32 to vector<16x1xf32>
    %299 = arith.addf %297, %298 : vector<16x1xf32>
    %300 = math.rsqrt %299 : vector<16x1xf32>
    %301 = arith.mulf %275, %300 : vector<16x1xf32>
    %302 = arith.mulf %296, %301 : vector<16x1xf32>
    %303 = arith.subf %276, %302 : vector<16x1xf32>
    %c1_158 = arith.constant 1 : index
    %c0_159 = arith.constant 0 : index
    %c0_160 = arith.constant 0 : index
    %304 = vector.load %arg26[%c1_158, %c0_159, %c0_160] : memref<2x16x16xf32, #tpu.memory_space<vmem>>, vector<1x16x16xf32>
    %305 = vector.shape_cast %304 : vector<1x16x16xf32> to vector<16x16xf32>
    %306 = vector.broadcast %301 : vector<16x1xf32> to vector<16x16xf32>
    %307 = arith.mulf %305, %306 : vector<16x16xf32>
    %308 = vector.broadcast %303 : vector<16x1xf32> to vector<16x16xf32>
    %309 = arith.addf %307, %308 : vector<16x16xf32>
    %cst_161 = arith.constant 0.000000e+00 : f32
    %310 = vector.broadcast %cst_161 : f32 to vector<16x16xf32>
    %311 = arith.maximumf %309, %310 : vector<16x16xf32>
    %c1_162 = arith.constant 1 : index
    %c0_163 = arith.constant 0 : index
    %c0_164 = arith.constant 0 : index
    %312 = vector.load %arg26[%c1_162, %c0_163, %c0_164] : memref<2x16x16xf32, #tpu.memory_space<vmem>>, vector<1x16x16xf32>
    %313 = vector.shape_cast %312 : vector<1x16x16xf32> to vector<16x16xf32>
    %314 = vector.shape_cast %311 : vector<16x16xf32> to vector<1x16x16xf32>
    tpu.vector_store %arg26[%c1_162, %c0_163, %c0_164], %314 {strides = array<i32>} : memref<2x16x16xf32, #tpu.memory_space<vmem>>, vector<1x16x16xf32>,
    %c0_165 = arith.constant 0 : index
    %c0_166 = arith.constant 0 : index
    %315 = vector.load %arg20[%c0_165, %c0_166] : memref<32x64xf32, #tpu.memory_space<vmem>>, vector<32x64xf32>
    %c0_167 = arith.constant 0 : index
    %c0_168 = arith.constant 0 : index
    %316 = vector.load %arg21[%c0_167, %c0_168] : memref<32x1xf32, #tpu.memory_space<vmem>>, vector<32x1xf32>
    %c0_169 = arith.constant 0 : index
    %c0_170 = arith.constant 0 : index
    %c0_171 = arith.constant 0 : index
    %317 = vector.load %arg18[%c0_169, %c0_170, %c0_171] : memref<2x32x4xf32, #tpu.memory_space<vmem>>, vector<1x32x4xf32>
    %318 = vector.shape_cast %317 : vector<1x32x4xf32> to vector<32x4xf32>
    %c0_172 = arith.constant 0 : index
    %c0_173 = arith.constant 0 : index
    %c0_174 = arith.constant 0 : index
    %319 = vector.load %arg19[%c0_172, %c0_173, %c0_174] : memref<2x32x4xf32, #tpu.memory_space<vmem>>, vector<1x32x4xf32>
    %320 = vector.shape_cast %319 : vector<1x32x4xf32> to vector<32x4xf32>
    %321 = tpu.concatenate %318, %320 in 0 : vector<32x4xf32>, vector<32x4xf32> -> vector<64x4xf32>
    %cst_175 = arith.constant dense<0.000000e+00> : vector<32x4xf32>
    %322 = tpu.matmul %315, %321, %cst_175 {dimension_numbers = #tpu.dot_dimension_numbers<[1], [0], [0], [1], [0, 0, 1, 1], [], []>} : vector<32x64xf32>, vector<64x4xf32>, vector<32x4xf32> -> vector<32x4xf32>
    %323 = vector.broadcast %316 : vector<32x1xf32> to vector<32x4xf32>
    %324 = arith.addf %322, %323 : vector<32x4xf32>
    %cst_176 = arith.constant dense<0.000000e+00> : vector<32xf32>
    %325 = vector.multi_reduction <add>, %324, %cst_176 [1] : vector<32x4xf32> to vector<32xf32>
    %326 = vector.shape_cast %325 : vector<32xf32> to vector<32x1xf32>
    %cst_177 = arith.constant 4.000000e+00 : f32
    %327 = vector.broadcast %cst_177 : f32 to vector<32x1xf32>
    %328 = arith.divf %326, %327 : vector<32x1xf32>
    %329 = vector.broadcast %328 : vector<32x1xf32> to vector<32x4xf32>
    %330 = arith.subf %324, %329 : vector<32x4xf32>
    %331 = arith.mulf %330, %330 : vector<32x4xf32>
    %cst_178 = arith.constant dense<0.000000e+00> : vector<32xf32>
    %332 = vector.multi_reduction <add>, %331, %cst_178 [1] : vector<32x4xf32> to vector<32xf32>
    %333 = vector.shape_cast %332 : vector<32xf32> to vector<32x1xf32>
    %cst_179 = arith.constant 4.000000e+00 : f32
    %334 = vector.broadcast %cst_179 : f32 to vector<32x1xf32>
    %335 = arith.divf %333, %334 : vector<32x1xf32>
    %c0_180 = arith.constant 0 : index
    %c0_181 = arith.constant 0 : index
    %c0_182 = arith.constant 0 : index
    %336 = vector.load %arg27[%c0_180, %c0_181, %c0_182] : memref<2x32x4xf32, #tpu.memory_space<vmem>>, vector<1x32x4xf32>
    %337 = vector.shape_cast %336 : vector<1x32x4xf32> to vector<32x4xf32>
    %338 = vector.shape_cast %324 : vector<32x4xf32> to vector<1x32x4xf32>
    tpu.vector_store %arg27[%c0_180, %c0_181, %c0_182], %338 {strides = array<i32>} : memref<2x32x4xf32, #tpu.memory_space<vmem>>, vector<1x32x4xf32>,
    %c1_183 = arith.constant 1 : index
    %c0_184 = arith.constant 0 : index
    %c0_185 = arith.constant 0 : index
    %339 = vector.load %arg18[%c1_183, %c0_184, %c0_185] : memref<2x32x4xf32, #tpu.memory_space<vmem>>, vector<1x32x4xf32>
    %340 = vector.shape_cast %339 : vector<1x32x4xf32> to vector<32x4xf32>
    %c1_186 = arith.constant 1 : index
    %c0_187 = arith.constant 0 : index
    %c0_188 = arith.constant 0 : index
    %341 = vector.load %arg19[%c1_186, %c0_187, %c0_188] : memref<2x32x4xf32, #tpu.memory_space<vmem>>, vector<1x32x4xf32>
    %342 = vector.shape_cast %341 : vector<1x32x4xf32> to vector<32x4xf32>
    %343 = tpu.concatenate %340, %342 in 0 : vector<32x4xf32>, vector<32x4xf32> -> vector<64x4xf32>
    %cst_189 = arith.constant dense<0.000000e+00> : vector<32x4xf32>
    %344 = tpu.matmul %315, %343, %cst_189 {dimension_numbers = #tpu.dot_dimension_numbers<[1], [0], [0], [1], [0, 0, 1, 1], [], []>} : vector<32x64xf32>, vector<64x4xf32>, vector<32x4xf32> -> vector<32x4xf32>
    %345 = vector.broadcast %316 : vector<32x1xf32> to vector<32x4xf32>
    %346 = arith.addf %344, %345 : vector<32x4xf32>
    %cst_190 = arith.constant dense<0.000000e+00> : vector<32xf32>
    %347 = vector.multi_reduction <add>, %346, %cst_190 [1] : vector<32x4xf32> to vector<32xf32>
    %348 = vector.shape_cast %347 : vector<32xf32> to vector<32x1xf32>
    %cst_191 = arith.constant 4.000000e+00 : f32
    %349 = vector.broadcast %cst_191 : f32 to vector<32x1xf32>
    %350 = arith.divf %348, %349 : vector<32x1xf32>
    %351 = vector.broadcast %350 : vector<32x1xf32> to vector<32x4xf32>
    %352 = arith.subf %346, %351 : vector<32x4xf32>
    %353 = arith.mulf %352, %352 : vector<32x4xf32>
    %cst_192 = arith.constant dense<0.000000e+00> : vector<32xf32>
    %354 = vector.multi_reduction <add>, %353, %cst_192 [1] : vector<32x4xf32> to vector<32xf32>
    %355 = vector.shape_cast %354 : vector<32xf32> to vector<32x1xf32>
    %cst_193 = arith.constant 4.000000e+00 : f32
    %356 = vector.broadcast %cst_193 : f32 to vector<32x1xf32>
    %357 = arith.divf %355, %356 : vector<32x1xf32>
    %c1_194 = arith.constant 1 : index
    %c0_195 = arith.constant 0 : index
    %c0_196 = arith.constant 0 : index
    %358 = vector.load %arg27[%c1_194, %c0_195, %c0_196] : memref<2x32x4xf32, #tpu.memory_space<vmem>>, vector<1x32x4xf32>
    %359 = vector.shape_cast %358 : vector<1x32x4xf32> to vector<32x4xf32>
    %360 = vector.shape_cast %346 : vector<32x4xf32> to vector<1x32x4xf32>
    tpu.vector_store %arg27[%c1_194, %c0_195, %c0_196], %360 {strides = array<i32>} : memref<2x32x4xf32, #tpu.memory_space<vmem>>, vector<1x32x4xf32>,
    %cst_197 = arith.constant 0.000000e+00 : f32
    %361 = vector.broadcast %cst_197 : f32 to vector<32x1xf32>
    %362 = arith.addf %361, %328 : vector<32x1xf32>
    %363 = arith.addf %362, %350 : vector<32x1xf32>
    %cst_198 = arith.constant 5.000000e-01 : f32
    %364 = vector.broadcast %cst_198 : f32 to vector<32x1xf32>
    %365 = arith.mulf %363, %364 : vector<32x1xf32>
    %366 = arith.mulf %328, %328 : vector<32x1xf32>
    %367 = arith.addf %335, %366 : vector<32x1xf32>
    %cst_199 = arith.constant 0.000000e+00 : f32
    %368 = vector.broadcast %cst_199 : f32 to vector<32x1xf32>
    %369 = arith.addf %368, %367 : vector<32x1xf32>
    %370 = arith.mulf %350, %350 : vector<32x1xf32>
    %371 = arith.addf %357, %370 : vector<32x1xf32>
    %372 = arith.addf %369, %371 : vector<32x1xf32>
    %cst_200 = arith.constant 5.000000e-01 : f32
    %373 = vector.broadcast %cst_200 : f32 to vector<32x1xf32>
    %374 = arith.mulf %372, %373 : vector<32x1xf32>
    %375 = arith.mulf %365, %365 : vector<32x1xf32>
    %376 = arith.subf %374, %375 : vector<32x1xf32>
    %377 = tpu.iota {dimensions = array<i32: 0>} : vector<32x1xi32>
    %c16_i32 = arith.constant 16 : i32
    %378 = vector.broadcast %c16_i32 : i32 to vector<32x1xi32>
    %379 = arith.cmpi slt, %377, %378 : vector<32x1xi32>
    %c0_201 = arith.constant 0 : index
    %c0_202 = arith.constant 0 : index
    %380 = vector.load %arg22[%c0_201, %c0_202] : memref<32x1xf32, #tpu.memory_space<vmem>>, vector<32x1xf32>
    %c0_203 = arith.constant 0 : index
    %c0_204 = arith.constant 0 : index
    %381 = vector.load %arg23[%c0_203, %c0_204] : memref<32x1xf32, #tpu.memory_space<vmem>>, vector<32x1xf32>
    %382 = arith.select %379, %365, %328 : vector<32x1xi1>, vector<32x1xf32>
    %383 = arith.select %379, %376, %335 : vector<32x1xi1>, vector<32x1xf32>
    %cst_205 = arith.constant 9.99999974E-6 : f32
    %384 = vector.broadcast %cst_205 : f32 to vector<32x1xf32>
    %385 = arith.addf %383, %384 : vector<32x1xf32>
    %386 = math.rsqrt %385 : vector<32x1xf32>
    %387 = arith.mulf %380, %386 : vector<32x1xf32>
    %388 = arith.mulf %382, %387 : vector<32x1xf32>
    %389 = arith.subf %381, %388 : vector<32x1xf32>
    %c0_206 = arith.constant 0 : index
    %c0_207 = arith.constant 0 : index
    %c0_208 = arith.constant 0 : index
    %390 = vector.load %arg27[%c0_206, %c0_207, %c0_208] : memref<2x32x4xf32, #tpu.memory_space<vmem>>, vector<1x32x4xf32>
    %391 = vector.shape_cast %390 : vector<1x32x4xf32> to vector<32x4xf32>
    %392 = vector.broadcast %387 : vector<32x1xf32> to vector<32x4xf32>
    %393 = arith.mulf %391, %392 : vector<32x4xf32>
    %394 = vector.broadcast %389 : vector<32x1xf32> to vector<32x4xf32>
    %395 = arith.addf %393, %394 : vector<32x4xf32>
    %cst_209 = arith.constant 0.000000e+00 : f32
    %396 = vector.broadcast %cst_209 : f32 to vector<32x4xf32>
    %397 = arith.maximumf %395, %396 : vector<32x4xf32>
    %c0_210 = arith.constant 0 : index
    %c0_211 = arith.constant 0 : index
    %c0_212 = arith.constant 0 : index
    %398 = vector.load %arg27[%c0_210, %c0_211, %c0_212] : memref<2x32x4xf32, #tpu.memory_space<vmem>>, vector<1x32x4xf32>
    %399 = vector.shape_cast %398 : vector<1x32x4xf32> to vector<32x4xf32>
    %400 = vector.shape_cast %397 : vector<32x4xf32> to vector<1x32x4xf32>
    tpu.vector_store %arg27[%c0_210, %c0_211, %c0_212], %400 {strides = array<i32>} : memref<2x32x4xf32, #tpu.memory_space<vmem>>, vector<1x32x4xf32>,
    %401 = arith.select %379, %365, %350 : vector<32x1xi1>, vector<32x1xf32>
    %402 = arith.select %379, %376, %357 : vector<32x1xi1>, vector<32x1xf32>
    %cst_213 = arith.constant 9.99999974E-6 : f32
    %403 = vector.broadcast %cst_213 : f32 to vector<32x1xf32>
    %404 = arith.addf %402, %403 : vector<32x1xf32>
    %405 = math.rsqrt %404 : vector<32x1xf32>
    %406 = arith.mulf %380, %405 : vector<32x1xf32>
    %407 = arith.mulf %401, %406 : vector<32x1xf32>
    %408 = arith.subf %381, %407 : vector<32x1xf32>
    %c1_214 = arith.constant 1 : index
    %c0_215 = arith.constant 0 : index
    %c0_216 = arith.constant 0 : index
    %409 = vector.load %arg27[%c1_214, %c0_215, %c0_216] : memref<2x32x4xf32, #tpu.memory_space<vmem>>, vector<1x32x4xf32>
    %410 = vector.shape_cast %409 : vector<1x32x4xf32> to vector<32x4xf32>
    %411 = vector.broadcast %406 : vector<32x1xf32> to vector<32x4xf32>
    %412 = arith.mulf %410, %411 : vector<32x4xf32>
    %413 = vector.broadcast %408 : vector<32x1xf32> to vector<32x4xf32>
    %414 = arith.addf %412, %413 : vector<32x4xf32>
    %cst_217 = arith.constant 0.000000e+00 : f32
    %415 = vector.broadcast %cst_217 : f32 to vector<32x4xf32>
    %416 = arith.maximumf %414, %415 : vector<32x4xf32>
    %c1_218 = arith.constant 1 : index
    %c0_219 = arith.constant 0 : index
    %c0_220 = arith.constant 0 : index
    %417 = vector.load %arg27[%c1_218, %c0_219, %c0_220] : memref<2x32x4xf32, #tpu.memory_space<vmem>>, vector<1x32x4xf32>
    %418 = vector.shape_cast %417 : vector<1x32x4xf32> to vector<32x4xf32>
    %419 = vector.shape_cast %416 : vector<32x4xf32> to vector<1x32x4xf32>
    tpu.vector_store %arg27[%c1_218, %c0_219, %c0_220], %419 {strides = array<i32>} : memref<2x32x4xf32, #tpu.memory_space<vmem>>, vector<1x32x4xf32>,
    return
  }
}

</mosaic_0001>

<bundles_post_ra>
// kernel: tpu_custom_call.1
= control target key start
LH: loop header
LB: loop body
LE: loop exit
PB: predicated region body
PF: predicated region fallthrough
CT: control target
= control target key end

     0   :  { %s2554_s0 = inlined_call_operand.vmem [shape: f32[2,4,256], index: 0, kind: input, shape index: {}]   ;;  %s2555_s1 = inlined_call_operand.vmem [shape: f32[2,4,256], index: 1, kind: input, shape index: {}]   ;;  %s2556_s2 = inlined_call_operand.vmem [shape: f32[4,8], index: 2, kind: input, shape index: {}]   ;;  %s2557_s3 = inlined_call_operand.vmem [shape: f32[4,1], index: 3, kind: input, shape index: {}]   ;;  %s2558_s4 = inlined_call_operand.vmem [shape: f32[4,1], index: 4, kind: input, shape index: {}]   ;;  %s2559_s5 = inlined_call_operand.vmem [shape: f32[4,1], index: 5, kind: input, shape index: {}]   ;;  %s2560_s6 = inlined_call_operand.vmem [shape: f32[2,8,64], index: 6, kind: input, shape index: {}]   ;;  %s2561_s7 = inlined_call_operand.vmem [shape: f32[2,8,64], index: 7, kind: input, shape index: {}]   ;;  %s2562_s8 = inlined_call_operand.vmem [shape: f32[8,16], index: 8, kind: input, shape index: {}]   ;;  %s2563_s9 = inlined_call_operand.vmem [shape: f32[8,1], index: 9, kind: input, shape index: {}]   ;;  %s2564_s10 = inlined_call_operand.vmem [shape: f32[8,1], index: 10, kind: input, shape index: {}]   ;;  %s2565_s11 = inlined_call_operand.vmem [shape: f32[8,1], index: 11, kind: input, shape index: {}]   ;;  %s2566_s12 = inlined_call_operand.vmem [shape: f32[2,16,16], index: 12, kind: input, shape index: {}]   ;;  %s2567_s13 = inlined_call_operand.vmem [shape: f32[2,16,16], index: 13, kind: input, shape index: {}]   ;;  %s2568_s14 = inlined_call_operand.vmem [shape: f32[16,32], index: 14, kind: input, shape index: {}]   ;;  %s2569_s15 = inlined_call_operand.vmem [shape: f32[16,1], index: 15, kind: input, shape index: {}]   ;;  %s2570_s16 = inlined_call_operand.vmem [shape: f32[16,1], index: 16, kind: input, shape index: {}]   ;;  %s2571_s17 = inlined_call_operand.vmem [shape: f32[16,1], index: 17, kind: input, shape index: {}]   ;;  %s2572_s18 = inlined_call_operand.vmem [shape: f32[2,32,4], index: 18, kind: input, shape index: {}]   ;;  %s2573_s19 = inlined_call_operand.vmem [shape: f32[2,32,4], index: 19, kind: input, shape index: {}]   ;;  %s2574_s20 = inlined_call_operand.vmem [shape: f32[32,64], index: 20, kind: input, shape index: {}]   ;;  %s2575_s21 = inlined_call_operand.vmem [shape: f32[32,1], index: 21, kind: input, shape index: {}]   ;;  %s2576_s22 = inlined_call_operand.vmem [shape: f32[32,1], index: 22, kind: input, shape index: {}]   ;;  %s2577_s23 = inlined_call_operand.vmem [shape: f32[32,1], index: 23, kind: input, shape index: {}]   ;;  %s2578_s24 = inlined_call_operand.hbm [shape: f32[2,4,256], index: 24, kind: output, shape index: {0}]   ;;  %s2579_s25 = inlined_call_operand.hbm [shape: f32[2,8,64], index: 25, kind: output, shape index: {1}]   ;;  %s2580_s26 = inlined_call_operand.hbm [shape: f32[2,16,16], index: 26, kind: output, shape index: {2}]   ;;  %s2581_s27 = inlined_call_operand.vmem [shape: f32[2,32,4], index: 27, kind: output, shape index: {3}]  }
   0x1   :  { %2586 = sst [smem:[#allocation9_spill]] %s2554_s0 }
   0x2   :  { %2587 = sst [smem:[#allocation10_spill]] %s2555_s1 }
   0x3   :  { %2588 = sst [smem:[#allocation11_spill]] %s2556_s2 }
   0x4   :  { %2589 = sst [smem:[#allocation12_spill]] %s2557_s3 }
   0x5   :  { %2590 = sst [smem:[#allocation13_spill]] %s2558_s4 }
   0x6   :  { %2591 = sst [smem:[#allocation14_spill]] %s2559_s5 }
   0x7   :  { %2592 = sst [smem:[#allocation15_spill]] %s2560_s6 }
   0x8   :  { %2593 = sst [smem:[#allocation16_spill]] %s2561_s7 }
   0x9   :  { %2594 = sst [smem:[#allocation17_spill]] %s2562_s8 }
   0xa   :  { %2595 = sst [smem:[#allocation18_spill]] %s2563_s9 }
   0xb   :  { %2596 = sst [smem:[#allocation19_spill]] %s2564_s10 }
   0xc   :  { %2597 = sst [smem:[#allocation20_spill]] %s2565_s11 }
   0xd   :  { %33 = vsyncpa [#allocation3], 0  ;;  %s2598_s8 = sld [smem:[#allocation12_spill]]  ;;  %v1573_v2 = vmov 0   ;;  %v525_v4 = vld [vmem:[%s2569_s15] sm:$0xff]  ;;  %vm100_vm0 = vcmask 1043456  }
   0xe   :  { %s2599_s5 = sld [smem:[#allocation9_spill]]  ;;  %1460 = vset.pattern.permute.xlu0 %v1573_v2  ;;  %1461 = vset.pattern.permute.xlu1 %v1573_v2  ;;  %vm108_vm1 = vcmask 64512  }
   0xf   :  { %1462 = vset.pattern.permute.xlu2 %v1573_v2  ;;  %s2600_s10 = sld [smem:[#allocation10_spill]] }
  0x10   :  { %s2601_s2 = sld [smem:[#allocation18_spill]] }
  0x11   :  { %s2602_s30 = sld [smem:[#allocation11_spill]] }
  0x13   :  { %v84_v0 = vld [vmem:[%s2598_s8] sm:$0xf] }
  0x14   :  { %v85_v1 = vld [vmem:[%s2599_s5] sm:$0xff]  ;;  %105 = vperm.xlu0 %1460, %v84_v0   ;;  %v1389_v8 = vld [vmem:[%s2599_s5 + $0x8] sm:$0xff] }
  0x15   :  { %88 = vst [vmem:[#allocation1] ss:$2 sm:$0xff] %v85_v1  ;;  %v86_v3 = vld [vmem:[%s2600_s10] sm:$0xff] }
  0x16   :  { %v359_v7 = vld [vmem:[%s2601_s2] sm:$0xff] }
  0x17   :  { %364 = vperm.xlu1 %1461, %v359_v7   ;;  %v1745_v9 = vld [vmem:[%s2602_s30] sm:$0xf] }
  0x1c   :  { %v89_v5 = vld.sshfl [vmem:[#allocation1] sm:$0xff pattern:$0x75316420]  ;;  %v90_v6 = vld.sshfl [vmem:[#allocation1 + $0x8] sm:$0xff pattern:$0x75316420]  ;;  %533 = vperm.xlu0 %1460, %v525_v4  }
  0x1d   :  { %95 = vst [vmem:[#allocation1 + $0x1] ss:$2 sm:$0xff] %v86_v3 }
  0x1e   :  { %34 = vsyncpa [#allocation5], 0  ;;  %s2603_s0 = sld [smem:[#allocation16_spill]]  ;;  %v526_v16 = vld [vmem:[%s2569_s15 + $0x8] sm:$0xff]  ;;  %v813_v17 = vld [vmem:[%s2575_s21 + $0x10] sm:$0xff]  ;;  %vm367_vm2 = vcmask 130048  }
  0x1f   :  { %s2604_s4 = sld [smem:[#allocation15_spill]]  ;;  %v1774_v20 = vld [vmem:[%s2573_s19 + $0x18] sm:$0xff]  ;;  %835 = vperm.xlu1 %1461, %v813_v17   ;;  %v1784_v22 = vld [vmem:[%s2573_s19 + $0x10] sm:$0xff]  ;;  %v1390_v24 = vld [vmem:[%s2600_s10 + $0x8] sm:$0xff]  ;;  %vm391_vm3 = vcmask 523264   ;;  %vm541_vm4 = vcmask 261120  }
  0x20   :  { %v1779_v21 = vld [vmem:[%s2573_s19 + $0x38] sm:$0xff]  ;;  %v1789_v23 = vld [vmem:[%s2573_s19 + $0x30] sm:$0xff]  ;;  %v1799_v25 = vld [vmem:[%s2573_s19 + $0x8] sm:$0xff]  ;;  %s2605_s15 = sld [smem:[#allocation17_spill]]  ;;  %vm884_vm5 = vcmask 31744   ;;  %s1579_s29 = smov 128  }
  0x21   :  { %v1804_v26 = vld [vmem:[%s2573_s19 + $0x28] sm:$0xff]  ;;  %v1814_v30 = vld [vmem:[%s2573_s19] sm:$0xff]  ;;  %v1831_v33 = vld [vmem:[%s2572_s18 + $0x18] sm:$0xff]  ;;  %s2606_s7 = sld [smem:[#allocation19_spill]]  ;;  %s1580_s5 = smov 8  }
  0x22   :  { %v1819_v31 = vld [vmem:[%s2573_s19 + $0x20] sm:$0xff]  ;;  %v812_v32 = vld [vmem:[%s2575_s21 + $0x8] sm:$0xff]  ;;  %v1836_v34 = vld [vmem:[%s2572_s18 + $0x38] sm:$0xff]  ;;  %s2607_s8 = sld [smem:[#allocation20_spill]]  ;;  %s1336_s10 = sshll.u32 %s2578_s24, 4  ;;  %s1337_s10 = int_to_ptr.hbm [resolvable:$true] %s1336_s10 }
  0x23   :  { %v811_v35 = vld [vmem:[%s2575_s21] sm:$0xff]  ;;  %v1846_v36 = vld [vmem:[%s2572_s18 + $0x10] sm:$0xff]  ;;  %v816_v38 = vld [vmem:[%s2572_s18 + $0x8] sm:$0xff]  ;;  %s2608_s28 = sld [smem:[#allocation13_spill]] }
  0x24   :  { %v96_v10 = vld.sshfl [vmem:[#allocation1] sm:$0xff pattern:$0x75316420]  ;;  %v97_v11 = vld.sshfl [vmem:[#allocation1 + $0x8] sm:$0xff pattern:$0x75316420]  ;;  %538 = vperm.xlu0 %1460, %v526_v16   ;;  %825 = vperm.xlu2 %1462, %v811_v35  }
  0x25   :  { %v101_v12 = vsel %vm100_vm0, %v89_v5, %v96_v10  ;;  %v102_v13 = vsel %vm100_vm0, %v90_v6, %v97_v11  ;;  %186 = vst [vmem:[#allocation1] ss:$2 sm:$0xff] %v1389_v8  ;;  %v361_v14 = vld [vmem:[%s2603_s0] sm:$0xff]  ;;  %v1395_v15 = vld [vmem:[%s2603_s0 + $0x8] sm:$0xff]  ;;  %v1851_v37 = vld [vmem:[%s2572_s18 + $0x30] sm:$0xff]  ;;  %s2609_s11 = sld [smem:[#allocation14_spill]] }
  0x26   :  { %127 = vmatpush.msra.mxu0 %v101_v12  ;;  %147 = vmatpush.msra.mxu1 %v102_v13  ;;  %v360_v18 = vld [vmem:[%s2604_s4] sm:$0xff]  ;;  %v1394_v19 = vld [vmem:[%s2604_s4 + $0x8] sm:$0xff]  ;;  %v1402_v45 = vld [vmem:[%s2567_s13 + $0x18] sm:$0xff]  ;;  %s1349_s0 = sshll.u32 %s2579_s25, 4  ;;  %s1582_s4 = smov [#allocation2]   ;;  %s1350_s0 = int_to_ptr.hbm [resolvable:$true] %s1349_s0 }
  0x27   :  { %1387 = vmatmul.msk.f32.vlgmr.msra.gmra.mxu0 %vm108_vm1, %v1745_v9  ;;  %1388 = vmatmul.msk.f32.vlgmr.msra.gmra.mxu1 %vm108_vm1, %v1745_v9  ;;  %v358_v29 = vld [vmem:[%s2605_s15] sm:$0xff]  ;;  %v1410_v39 = vld [vmem:[%s2572_s18 + $0x28] sm:$0xff]  ;;  %v1401_v50 = vld [vmem:[%s2567_s13 + $0x10] sm:$0xff] }
  0x28   :  { %385 = vmatpush.msrb.mxu0 %v361_v14  ;;  %428 = vmatpush.msrb.mxu1 %v1395_v15  ;;  %v530_v44 = vld [vmem:[%s2567_s13 + $0x8] sm:$0xff]  ;;  %v815_v46 = vld [vmem:[%s2572_s18] sm:$0xff]  ;;  %v814_v51 = vld [vmem:[%s2575_s21 + $0x18] sm:$0xff] }
  0x29   :  { %v1409_v47 = vld [vmem:[%s2572_s18 + $0x20] sm:$0xff]  ;;  %v528_v52 = vld [vmem:[%s2566_s12 + $0x8] sm:$0xff]  ;;  %v1400_v53 = vld [vmem:[%s2566_s12 + $0x18] sm:$0xff] }
  0x2a   :  { %386 = vmatpush.msrb.mxu0 %v360_v18  ;;  %429 = vmatpush.msrb.mxu1 %v1394_v19  ;;  %v807_v48 = vld [vmem:[%s2574_s20] sm:$0xff]  ;;  %v1399_v55 = vld [vmem:[%s2566_s12 + $0x10] sm:$0xff]  ;;  %v808_v57 = vld [vmem:[%s2574_s20 + $0x8] sm:$0xff] }
  0x2b   :  { %v529_v49 = vld [vmem:[%s2567_s13] sm:$0xff]  ;;  %v524_v58 = vld [vmem:[%s2568_s14 + $0x8] sm:$0xff]  ;;  %v809_v59 = vld [vmem:[%s2574_s20 + $0x10] sm:$0xff] }
  0x2c   :  { %863 = vmatpush.msra.mxu0 %v1774_v20  ;;  %954 = vmatpush.msra.mxu1 %v1779_v21  ;;  %v187_v27 = vld.sshfl [vmem:[#allocation1] sm:$0xff pattern:$0x75316420]  ;;  %v188_v28 = vld.sshfl [vmem:[#allocation1 + $0x8] sm:$0xff pattern:$0x75316420] }
  0x2d   :  { %193 = vst [vmem:[#allocation1 + $0x1] ss:$2 sm:$0xff] %v1390_v24  ;;  %830 = vperm.xlu0 %1460, %v812_v32   ;;  %v527_v54 = vld [vmem:[%s2566_s12] sm:$0xff]  ;;  %840 = vperm.xlu2 %1462, %v814_v51   ;;  %v810_v60 = vld [vmem:[%s2574_s20 + $0x18] sm:$0xff]  ;;  %s1583_s20 = smov [#allocation6]  }
  0x2e   :  { %864 = vmatpush.msra.mxu0 %v1784_v22  ;;  %955 = vmatpush.msra.mxu1 %v1789_v23  ;;  %v523_v56 = vld [vmem:[%s2568_s14] sm:$0xff]  ;;  %s1334_s14 = sshll.u32 %s1582_s4, 4  ;;  %s1360_s30 = sshll.u32 %s1583_s20, 4  ;;  %s1335_s14 = int_to_ptr.vmem [resolvable:$true] %s1334_s14  ;;  %s1361_s30 = int_to_ptr.vmem [resolvable:$true] %s1360_s30 }
  0x2f   :  { %1393 = vmatmul.msk.f32.vlgmr.msrb.gmra.mxu0 %vm367_vm2, %v358_v29  ;;  %1396 = vmatmul.msk.f32.vlgmr.msrb.gmra.mxu1 %vm367_vm2, %v358_v29 }
  0x30   :  { %865 = vmatpush.msra.mxu0 %v1799_v25  ;;  %956 = vmatpush.msra.mxu1 %v1804_v26 }
  0x32   :  { %866 = vmatpush.msra.mxu0 %v1814_v30  ;;  %957 = vmatpush.msra.mxu1 %v1819_v31 }
  0x34   :  { %867 = vmatpush.msra.mxu0 %v1831_v33  ;;  %958 = vmatpush.msra.mxu1 %v1836_v34  ;;  %v194_v40 = vld.sshfl [vmem:[#allocation1] sm:$0xff pattern:$0x75316420]  ;;  %v195_v41 = vld.sshfl [vmem:[#allocation1 + $0x8] sm:$0xff pattern:$0x75316420] }
  0x35   :  { %v198_v42 = vsel %vm100_vm0, %v187_v27, %v194_v40  ;;  %v199_v43 = vsel %vm100_vm0, %v188_v28, %v195_v41 }
  0x36   :  { %868 = vmatpush.msra.mxu0 %v1846_v36  ;;  %959 = vmatpush.msra.mxu1 %v1851_v37 }
  0x37   :  { %215 = vmatpush.msra.mxu2 %v198_v42  ;;  %235 = vmatpush.msra.mxu3 %v199_v43 }
  0x38   :  { %869 = vmatpush.msra.mxu0 %v816_v38  ;;  %960 = vmatpush.msra.mxu1 %v1410_v39 }
  0x39   :  { %1391 = vmatmul.msk.f32.vlgmr.msra.gmra.mxu2 %vm108_vm1, %v1745_v9  ;;  %1392 = vmatmul.msk.f32.vlgmr.msra.gmra.mxu3 %vm108_vm1, %v1745_v9 }
  0x3a   :  { %560 = vmatpush.msrb.mxu2 %v530_v44  ;;  %618 = vmatpush.msrb.mxu3 %v1402_v45 }
  0x3b   :  { %870 = vmatpush.msra.mxu0 %v815_v46  ;;  %961 = vmatpush.msra.mxu1 %v1409_v47 }
  0x3c   :  { %1405 = vmatmul.msk.f32.vlgmr.msra.gmra.mxu0 %vm391_vm3, %v807_v48  ;;  %1417 = vmatmul.msk.f32.vlgmr.msra.gmra.mxu1 %vm391_vm3, %v807_v48 }
  0x3d   :  { %561 = vmatpush.msrb.mxu2 %v529_v49  ;;  %619 = vmatpush.msrb.mxu3 %v1401_v50 }
  0x3f   :  { %562 = vmatpush.msrb.mxu2 %v528_v52  ;;  %620 = vmatpush.msrb.mxu3 %v1400_v53 }
  0x41   :  { %563 = vmatpush.msrb.mxu2 %v527_v54  ;;  %621 = vmatpush.msrb.mxu3 %v1399_v55 }
  0x42   :  { %1397 = vmatmul.msk.f32.vlgmr.msrb.gmra.mxu2 %vm541_vm4, %v523_v56  ;;  %1403 = vmatmul.msk.f32.vlgmr.msrb.gmra.mxu3 %vm541_vm4, %v523_v56 }
  0x43   :  { %1433 = vmatpush.msra.mxu2 %v1774_v20  ;;  %1441 = vmatpush.msra.mxu3 %v1779_v21 }
  0x44   :  { %1406 = vmatmul.msk.f32.gmra.mxu0 %vm391_vm3, %v808_v57  ;;  %1418 = vmatmul.msk.f32.gmra.mxu1 %vm391_vm3, %v808_v57 }
  0x45   :  { %1434 = vmatpush.msra.mxu2 %v1784_v22  ;;  %1442 = vmatpush.msra.mxu3 %v1789_v23 }
  0x47   :  { %1435 = vmatpush.msra.mxu2 %v1799_v25  ;;  %1443 = vmatpush.msra.mxu3 %v1804_v26 }
  0x49   :  { %1436 = vmatpush.msra.mxu2 %v1814_v30  ;;  %1444 = vmatpush.msra.mxu3 %v1819_v31 }
  0x4a   :  { %1398 = vmatmul.msk.f32.gmra.mxu2 %vm541_vm4, %v524_v58  ;;  %1404 = vmatmul.msk.f32.gmra.mxu3 %vm541_vm4, %v524_v58 }
  0x4b   :  { %1437 = vmatpush.msra.mxu2 %v1831_v33  ;;  %1445 = vmatpush.msra.mxu3 %v1836_v34 }
  0x4d   :  { %1438 = vmatpush.msra.mxu2 %v1846_v36  ;;  %1446 = vmatpush.msra.mxu3 %v1851_v37 }
  0x4f   :  { %1439 = vmatpush.msra.mxu2 %v816_v38  ;;  %1447 = vmatpush.msra.mxu3 %v1410_v39 }
  0x51   :  { %1440 = vmatpush.msra.mxu2 %v815_v46  ;;  %1448 = vmatpush.msra.mxu3 %v1409_v47 }
  0x52   :  { %1407 = vmatmul.msk.f32.vlgmr.msra.gmra.mxu2 %vm391_vm3, %v809_v59  ;;  %1419 = vmatmul.msk.f32.vlgmr.msra.gmra.mxu3 %vm391_vm3, %v809_v59 }
  0x5a   :  { %1408 = vmatmul.msk.f32.gmra.mxu2 %vm391_vm3, %v810_v60  ;;  %1420 = vmatmul.msk.f32.gmra.mxu3 %vm391_vm3, %v810_v60 }
  0x7e   :  { %v826_v16 = vpop.permute.xlu2 %825 }
  0x86   :  { %v106_v61 = vpop.permute.xlu0 %105 }
  0x87   :  { %v841_v58 = vpop.permute.xlu2 %840 }
  0x89   :  { %v365_v8 = vpop.permute.xlu1 %364 }
  0x8e   :  { %v534_v7 = vpop.permute.xlu0 %533 }
  0x91   :  { %v836_v51 = vpop.permute.xlu1 %835 }
  0x96   :  { %v539_v15 = vpop.permute.xlu0 %538 }
  0x9f   :  { %v831_v30 = vpop.permute.xlu0 %830 }
  0xa4   :  { %v129_v62 = vpop.f32.mrf.mxu0  ;;  %v149_v63 = vpop.f32.mrf.mxu1 }
  0xa5   :  { %v1944_v0 = vadd.f32 %v129_v62, %v106_v61  ;;  %v1946_v1 = vadd.f32 %v149_v63, %v106_v61 }
  0xa7   :  { %v177_v2 = vrot.slane %v1946_v1, 4  ;;  %v152_v3 = vsel %vm100_vm0, %v1944_v0, 0.0  ;;  %v153_v4 = vsel %vm100_vm0, %v1946_v1, 0.0 }
  0xa8   :  { %v154_v5 = vadd.f32 %v153_v4, %v152_v3  ;;  %v1574_v3 = vmov 256.0  }
  0xa9   :  { %v178_v6 = vsel %vm100_vm0, %v1944_v0, %v177_v2  ;;  %1463 = vrcp.f32 %v1574_v3 }
  0xaa   :  { %180 = vst [vmem:[#allocation2] sm:$0xff] %v178_v6  ;;  %155 = vadd.xlane.f32.xlu0 %v154_v5  ;;  %v1575_v5 = vmov 64.0  }
  0xab   :  { %1465 = vrcp.f32 %v1575_v5 }
  0xac   :  { %v388_v9 = vpop.f32.mrf.mxu0  ;;  %v431_v10 = vpop.f32.mrf.mxu1 }
  0xad   :  { %v1955_v11 = vadd.f32 %v388_v9, %v365_v8  ;;  %v1957_v12 = vadd.f32 %v431_v10, %v365_v8 }
  0xaf   :  { %409 = vst.msk [vmem:[#allocation4] sm:$0xff] %vm391_vm3, %v1955_v11  ;;  %v392_v13 = vsel %vm391_vm3, %v1955_v11, 0.0  ;;  %v434_v14 = vsel %vm391_vm3, %v1957_v12, 0.0  ;;  %v1464_v4 = vpop.eup %1463 }
  0xb0   :  { %445 = vst.msk [vmem:[#allocation4 + $0x8] sm:$0xff] %vm391_vm3, %v1957_v12  ;;  %393 = vadd.xlane.f32.xlu2 %v392_v13  ;;  %v158_v6 = vmul.f32 256.0, %v1464_v4  ;;  %v1576_v13 = vmov 4.0   ;;  %vm162_vm6 = vweird.f32 %v1464_v4 }
  0xb1   :  { %1467 = vrcp.f32 %v1576_v13 }
  0xb2   :  { %435 = vadd.xlane.f32.xlu0 %v434_v14  ;;  %v159_v8 = vsub.f32 1.0, %v158_v6 }
  0xb4   :  { %v160_v10 = vmul.f32 %v1464_v4, %v159_v8 }
  0xb9   :  { %v872_v17 = vpop.f32.mrf.mxu0  ;;  %v963_v18 = vpop.f32.mrf.mxu1 }
  0xba   :  { %v1967_v19 = vadd.f32 %v872_v17, %v826_v16  ;;  %v1969_v20 = vadd.f32 %v963_v18, %v826_v16 }
  0xbc   :  { %932 = vst.msk [vmem:[%s2581_s27] sm:$0xff] %vm884_vm5, %v1967_v19  ;;  %v217_v21 = vpop.f32.mrf.mxu2  ;;  %v237_v22 = vpop.f32.mrf.mxu3  ;;  %v975_v23 = vsel %vm884_vm5, %v1969_v20, 0.0  ;;  %v885_v24 = vsel %vm884_vm5, %v1967_v19, 0.0 }
  0xbd   :  { %1421 = vst.msk [vmem:[%s2581_s27 + $0x20] sm:$0xff] %vm884_vm5, %v1969_v20  ;;  %v1985_v25 = vadd.f32 %v217_v21, %v106_v61  ;;  %v1987_v26 = vadd.f32 %v237_v22, %v106_v61  ;;  %976 = vadd.xlane.f32.xlu2 %v975_v23  ;;  %886 = vadd.xlane.f32.xlu0 %v885_v24 }
  0xbf   :  { %v258_v27 = vrot.slane %v1987_v26, 4  ;;  %v240_v28 = vsel %vm100_vm0, %v1985_v25, 0.0  ;;  %v241_v29 = vsel %vm100_vm0, %v1987_v26, 0.0 }
  0xc0   :  { %v242_v31 = vadd.f32 %v241_v29, %v240_v28 }
  0xc1   :  { %v259_v32 = vsel %vm100_vm0, %v1985_v25, %v258_v27  ;;  %v875_v33 = vpop.f32.mrf.mxu0  ;;  %v966_v34 = vpop.f32.mrf.mxu1 }
  0xc2   :  { %262 = vst [vmem:[#allocation2 + $0x8] sm:$0xff] %v259_v32  ;;  %v1996_v35 = vadd.f32 %v875_v33, %v831_v30  ;;  %v1998_v36 = vadd.f32 %v966_v34, %v831_v30  ;;  %243 = vadd.xlane.f32.xlu1 %v242_v31  ;;  %v275_v30 = vlaneseq }
  0xc4   :  { %933 = vst.msk [vmem:[%s2581_s27 + $0x8] sm:$0xff] %vm884_vm5, %v1996_v35  ;;  %v978_v37 = vsel %vm884_vm5, %v1998_v36, 0.0  ;;  %v888_v43 = vsel %vm884_vm5, %v1996_v35, 0.0 }
  0xc5   :  { %1422 = vst.msk [vmem:[%s2581_s27 + $0x28] sm:$0xff] %vm884_vm5, %v1998_v36  ;;  %v565_v38 = vpop.f32.mrf.mxu2  ;;  %v623_v39 = vpop.f32.mrf.mxu3  ;;  %979 = vadd.xlane.f32.xlu0 %v978_v37 }
  0xc6   :  { %v2012_v40 = vadd.f32 %v565_v38, %v534_v7  ;;  %v2014_v41 = vadd.f32 %v623_v39, %v534_v7  ;;  %v1466_v7 = vpop.eup %1465  ;;  %v1577_v39 = vmov 16.0  }
  0xc7   :  { %v396_v9 = vmul.f32 64.0, %v1466_v7  ;;  %v1468_v16 = vpop.eup %1467  ;;  %vm400_vm7 = vweird.f32 %v1466_v7  ;;  %1469 = vrcp.f32 %v1577_v39 }
  0xc8   :  { %598 = vst.msk [vmem:[#allocation6] sm:$0xff] %vm367_vm2, %v2012_v40  ;;  %v629_v42 = vsel %vm367_vm2, %v2014_v41, 0.0  ;;  %v571_v44 = vsel %vm367_vm2, %v2012_v40, 0.0  ;;  %v898_v22 = vmul.f32 4.0, %v1468_v16  ;;  %vm902_vm9 = vweird.f32 %v1468_v16 }
  0xc9   :  { %650 = vst.msk [vmem:[#allocation6 + $0x10] sm:$0xff] %vm367_vm2, %v2014_v41  ;;  %630 = vadd.xlane.f32.xlu2 %v629_v42  ;;  %v397_v14 = vsub.f32 1.0, %v396_v9 }
  0xca   :  { %889 = vadd.xlane.f32.xlu1 %v888_v43  ;;  %v899_v29 = vsub.f32 1.0, %v898_v22 }
  0xcb   :  { %v398_v17 = vmul.f32 %v1466_v7, %v397_v14 }
  0xcd   :  { %v568_v45 = vpop.f32.mrf.mxu2  ;;  %v626_v46 = vpop.f32.mrf.mxu3  ;;  %572 = vadd.xlane.f32.xlu0 %v571_v44  ;;  %v399_v24 = vadd.f32 %v1466_v7, %v398_v17  ;;  %v900_v44 = vmul.f32 %v1468_v16, %v899_v29 }
  0xce   :  { %v2026_v47 = vadd.f32 %v568_v45, %v539_v15  ;;  %v2028_v48 = vadd.f32 %v626_v46, %v539_v15  ;;  %v161_v15 = vadd.f32 %v1464_v4, %v160_v10 }
  0xcf   :  { %v2083_v31 = vsel %vm400_vm7, %v1466_v7, %v399_v24 }
  0xd0   :  { %599 = vst.msk [vmem:[#allocation6 + $0x8] sm:$0xff] %vm367_vm2, %v2026_v47  ;;  %v574_v49 = vsel %vm367_vm2, %v2026_v47, 0.0  ;;  %v632_v50 = vsel %vm367_vm2, %v2028_v48, 0.0  ;;  %v2074_v18 = vsel %vm162_vm6, %v1464_v4, %v161_v15 }
  0xd1   :  { %651 = vst.msk [vmem:[#allocation6 + $0x18] sm:$0xff] %vm367_vm2, %v2028_v48  ;;  %575 = vadd.xlane.f32.xlu2 %v574_v49 }
  0xd2   :  { %633 = vadd.xlane.f32.xlu1 %v632_v50 }
  0xd5   :  { %v878_v52 = vpop.f32.mrf.mxu2  ;;  %v969_v53 = vpop.f32.mrf.mxu3 }
  0xd6   :  { %v2038_v54 = vadd.f32 %v878_v52, %v836_v51  ;;  %v2040_v55 = vadd.f32 %v969_v53, %v836_v51  ;;  %v901_v51 = vadd.f32 %v1468_v16, %v900_v44  ;;  %v1470_v52 = vpop.eup %1469 }
  0xd7   :  { %vm582_vm11 = vweird.f32 %v1470_v52 }
  0xd8   :  { %934 = vst.msk [vmem:[%s2581_s27 + $0x10] sm:$0xff] %vm884_vm5, %v2038_v54  ;;  %v981_v56 = vsel %vm884_vm5, %v2040_v55, 0.0  ;;  %v891_v57 = vsel %vm884_vm5, %v2038_v54, 0.0 }
  0xd9   :  { %1423 = vst.msk [vmem:[%s2581_s27 + $0x30] sm:$0xff] %vm884_vm5, %v2040_v55  ;;  %982 = vadd.xlane.f32.xlu0 %v981_v56 }
  0xda   :  { %892 = vadd.xlane.f32.xlu1 %v891_v57 }
  0xdd   :  { %v881_v59 = vpop.f32.mrf.mxu2  ;;  %v972_v60 = vpop.f32.mrf.mxu3 }
  0xde   :  { %v2056_v61 = vadd.f32 %v881_v59, %v841_v58  ;;  %v2058_v62 = vadd.f32 %v972_v60, %v841_v58  ;;  %v2117_v59 = vsel %vm902_vm9, %v1468_v16, %v901_v51  ;;  %v578_v60 = vmul.f32 16.0, %v1470_v52 }
  0xe0   :  { %935 = vst.msk [vmem:[%s2581_s27 + $0x18] sm:$0xff] %vm884_vm5, %v2056_v61  ;;  %v894_v63 = vsel %vm884_vm5, %v2056_v61, 0.0  ;;  %v984_v2 = vsel %vm884_vm5, %v2058_v62, 0.0  ;;  %v579_v6 = vsub.f32 1.0, %v578_v60 }
  0xe1   :  { %1424 = vst.msk [vmem:[%s2581_s27 + $0x38] sm:$0xff] %vm884_vm5, %v2058_v62  ;;  %895 = vadd.xlane.f32.xlu2 %v894_v63 }
  0xe2   :  { %985 = vadd.xlane.f32.xlu1 %v984_v2  ;;  %v580_v14 = vmul.f32 %v1470_v52, %v579_v6 }
  0xe4   :  { %v581_v22 = vadd.f32 %v1470_v52, %v580_v14 }
 0x11d   :  { %v156_v21 = vpop.xlane.xlu0 %155 }
 0x11e   :  { %v2077_v23 = vmul.f32 %v2074_v18, %v156_v21 }
 0x120   :  { %v165_v27 = vsub.f32 %v1944_v0, %v2077_v23  ;;  %v166_v28 = vsub.f32 %v1946_v1, %v2077_v23  ;;  %v2090_v1 = vshrl.u32 %v275_v30, 7 }
 0x122   :  { %v167_v32 = vmul.f32 %v165_v27, %v165_v27  ;;  %v168_v33 = vmul.f32 %v166_v28, %v166_v28  ;;  %vm458_vm8 = vcmp.lt.s32.totalorder %v2090_v1, 4  ;;  %vm277_vm10 = vcmp.lt.s32.totalorder %v2090_v1, 2 }
 0x123   :  { %v394_v34 = vpop.xlane.xlu2 %393 }
 0x124   :  { %v169_v37 = vsel %vm100_vm0, %v167_v32, 0.0  ;;  %v170_v38 = vsel %vm100_vm0, %v168_v33, 0.0  ;;  %v2088_v42 = vmul.f32 %v2083_v31, %v394_v34 }
 0x125   :  { %v436_v0 = vpop.xlane.xlu0 %435  ;;  %v171_v43 = vadd.f32 %v170_v38, %v169_v37 }
 0x126   :  { %v2093_v45 = vmul.f32 %v436_v0, %v2083_v31  ;;  %v403_v46 = vsub.f32 %v1955_v11, %v2088_v42 }
 0x127   :  { %172 = vadd.xlane.f32.xlu1 %v171_v43 }
 0x128   :  { %v447_v49 = vadd.f32 %v2093_v45, %v2088_v42  ;;  %v438_v50 = vsub.f32 %v1957_v12, %v2093_v45  ;;  %v404_v57 = vmul.f32 %v403_v46, %v403_v46 }
 0x12a   :  { %v2102_v53 = vmul.f32 0.5, %v447_v49  ;;  %v439_v56 = vmul.f32 %v438_v50, %v438_v50  ;;  %v405_v63 = vsel %vm391_vm3, %v404_v57, 0.0 }
 0x12c   :  { %v440_v58 = vsel %vm391_vm3, %v439_v56, 0.0  ;;  %v2109_v11 = vsel %vm458_vm8, %v2102_v53, %v2093_v45  ;;  %v2115_v12 = vsel %vm458_vm8, %v2102_v53, %v2088_v42 }
 0x12d   :  { %441 = vadd.xlane.f32.xlu0 %v440_v58 }
 0x12f   :  { %406 = vadd.xlane.f32.xlu1 %v405_v63 }
 0x130   :  { %v977_v2 = vpop.xlane.xlu2 %976  ;;  %v887_v3 = vpop.xlane.xlu0 %886 }
 0x131   :  { %v2121_v4 = vmul.f32 %v977_v2, %v2117_v59  ;;  %v2124_v5 = vmul.f32 %v2117_v59, %v887_v3 }
 0x133   :  { %v2128_v7 = vadd.f32 %v2121_v4, %v2124_v5  ;;  %v908_v8 = vsub.f32 %v1967_v19, %v2124_v5  ;;  %v991_v16 = vsub.f32 %v1969_v20, %v2121_v4 }
 0x135   :  { %v244_v9 = vpop.xlane.xlu1 %243  ;;  %v912_v10 = vmul.f32 %v908_v8, %v908_v8  ;;  %v995_v24 = vmul.f32 %v991_v16, %v991_v16 }
 0x136   :  { %v2133_v13 = vmul.f32 %v244_v9, %v2074_v18 }
 0x137   :  { %v916_v15 = vsel %vm884_vm5, %v912_v10, 0.0  ;;  %v999_v34 = vsel %vm884_vm5, %v995_v24, 0.0 }
 0x138   :  { %v264_v17 = vadd.f32 %v2133_v13, %v2077_v23  ;;  %917 = vadd.xlane.f32.xlu2 %v916_v15  ;;  %v980_v21 = vpop.xlane.xlu0 %979  ;;  %v246_v27 = vsub.f32 %v1985_v25, %v2133_v13  ;;  %v247_v28 = vsub.f32 %v1987_v26, %v2133_v13  ;;  %v2162_v25 = vsel %vm582_vm11, %v1470_v52, %v581_v22 }
 0x139   :  { %v2160_v32 = vmul.f32 %v980_v21, %v2117_v59 }
 0x13a   :  { %v2141_v19 = vmul.f32 0.5, %v264_v17  ;;  %v248_v37 = vmul.f32 %v246_v27, %v246_v27  ;;  %v249_v38 = vmul.f32 %v247_v28, %v247_v28 }
 0x13b   :  { %v992_v57 = vsub.f32 %v1998_v36, %v2160_v32 }
 0x13c   :  { %v2151_v20 = vsel %vm277_vm10, %v2141_v19, %v2077_v23  ;;  %v2157_v30 = vsel %vm277_vm10, %v2141_v19, %v2133_v13  ;;  %v631_v33 = vpop.xlane.xlu2 %630  ;;  %v250_v51 = vsel %vm100_vm0, %v248_v37, 0.0  ;;  %v251_v52 = vsel %vm100_vm0, %v249_v38, 0.0 }
 0x13d   :  { %v890_v29 = vpop.xlane.xlu1 %889  ;;  %v2175_v44 = vmul.f32 %v631_v33, %v2162_v25  ;;  %v252_v2 = vadd.f32 %v251_v52, %v250_v51 }
 0x13e   :  { %v2165_v26 = vmul.f32 %v2117_v59, %v890_v29 }
 0x13f   :  { %v637_v14 = vsub.f32 %v2014_v41, %v2175_v44  ;;  %v664_v1 = vmul.f32 %v2175_v44, %v2175_v44 }
 0x140   :  { %v2170_v39 = vadd.f32 %v2160_v32, %v2165_v26  ;;  %1000 = vadd.xlane.f32.xlu2 %v999_v34  ;;  %v573_v0 = vpop.xlane.xlu0 %572  ;;  %v909_v43 = vsub.f32 %v1996_v35, %v2165_v26 }
 0x141   :  { %v2178_v46 = vmul.f32 %v2162_v25, %v573_v0  ;;  %v639_v41 = vmul.f32 %v637_v14, %v637_v14 }
 0x142   :  { %v913_v49 = vmul.f32 %v909_v43, %v909_v43 }
 0x143   :  { %v2182_v50 = vadd.f32 %v2175_v44, %v2178_v46  ;;  %v586_v56 = vsub.f32 %v2012_v40, %v2178_v46  ;;  %v996_v40 = vmul.f32 %v992_v57, %v992_v57  ;;  %v641_v34 = vsel %vm367_vm2, %v639_v41, 0.0 }
 0x144   :  { %v919_v35 = vsel %vm884_vm5, %v913_v49, 0.0  ;;  %v576_v9 = vpop.xlane.xlu2 %575  ;;  %v1032_v41 = vmul.f32 %v2124_v5, %v2124_v5 }
 0x145   :  { %v634_v58 = vpop.xlane.xlu1 %633  ;;  %920 = vadd.xlane.f32.xlu0 %v919_v35  ;;  %v588_v60 = vmul.f32 %v586_v56, %v586_v56  ;;  %v1002_v36 = vsel %vm884_vm5, %v996_v40, 0.0  ;;  %v2210_v22 = vmul.f32 %v2162_v25, %v576_v9 }
 0x146   :  { %v2192_v63 = vmul.f32 %v634_v58, %v2162_v25 }
 0x147   :  { %v590_v3 = vsel %vm367_vm2, %v588_v60, 0.0  ;;  %v587_v29 = vsub.f32 %v2026_v47, %v2210_v22 }
 0x148   :  { %v638_v6 = vsub.f32 %v2028_v48, %v2192_v63  ;;  %253 = vadd.xlane.f32.xlu2 %v252_v2  ;;  %591 = vadd.xlane.f32.xlu1 %v590_v3  ;;  %v452_v3 = vmul.f32 %v2093_v45, %v2093_v45 }
 0x149   :  { %v589_v47 = vmul.f32 %v587_v29, %v587_v29 }
 0x14a   :  { %v640_v8 = vmul.f32 %v638_v6, %v638_v6 }
 0x14b   :  { %v593_v52 = vsel %vm367_vm2, %v589_v47, 0.0 }
 0x14c   :  { %v983_v10 = vpop.xlane.xlu0 %982  ;;  %v644_v21 = vsel %vm367_vm2, %v640_v8, 0.0 }
 0x14d   :  { %v2201_v15 = vmul.f32 %v983_v10, %v2117_v59  ;;  %v893_v16 = vpop.xlane.xlu1 %892  ;;  %1003 = vadd.xlane.f32.xlu0 %v1002_v36  ;;  %v456_v36 = vmul.f32 %v2102_v53, %v2102_v53  ;;  %v1044_v53 = vmul.f32 %v2121_v4, %v2121_v4 }
 0x14e   :  { %v2204_v17 = vmul.f32 %v2117_v59, %v893_v16 }
 0x14f   :  { %v993_v48 = vsub.f32 %v2040_v55, %v2201_v15 }
 0x150   :  { %v910_v24 = vsub.f32 %v2038_v54, %v2204_v17  ;;  %645 = vadd.xlane.f32.xlu2 %v644_v21 }
 0x151   :  { %v997_v28 = vmul.f32 %v993_v48, %v993_v48 }
 0x152   :  { %v914_v27 = vmul.f32 %v910_v24, %v910_v24 }
 0x153   :  { %v1005_v0 = vsel %vm884_vm5, %v997_v28, 0.0  ;;  %v2251_v28 = vmul.f32 0.5, %v2128_v7 }
 0x154   :  { %v896_v33 = vpop.xlane.xlu2 %895  ;;  %v922_v55 = vsel %vm884_vm5, %v914_v27, 0.0 }
 0x155   :  { %v2219_v37 = vmul.f32 %v2117_v59, %v896_v33  ;;  %v986_v38 = vpop.xlane.xlu1 %985  ;;  %642 = vadd.xlane.f32.xlu0 %v641_v34  ;;  %923 = vadd.xlane.f32.xlu1 %v922_v55  ;;  %v1060_v5 = vmul.f32 %v2251_v28, %v2251_v28 }
 0x156   :  { %v2225_v43 = vmul.f32 %v986_v38, %v2117_v59 }
 0x157   :  { %v911_v54 = vsub.f32 %v2056_v61, %v2219_v37 }
 0x158   :  { %1006 = vadd.xlane.f32.xlu2 %v1005_v0  ;;  %v994_v51 = vsub.f32 %v2058_v62, %v2225_v43  ;;  %v449_v62 = vmul.f32 %v2088_v42, %v2088_v42 }
 0x159   :  { %v915_v49 = vmul.f32 %v911_v54, %v911_v54 }
 0x15a   :  { %v998_v35 = vmul.f32 %v994_v51, %v994_v51 }
 0x15b   :  { %v925_v56 = vsel %vm884_vm5, %v915_v49, 0.0 }
 0x15c   :  { %v1008_v61 = vsel %vm884_vm5, %v998_v35, 0.0 }
 0x15d   :  { %594 = vadd.xlane.f32.xlu0 %v593_v52  ;;  %926 = vadd.xlane.f32.xlu1 %v925_v56  ;;  %v266_v52 = vmul.f32 %v2077_v23, %v2077_v23  ;;  %v1033_v23 = vmul.f32 %v2165_v26, %v2165_v26 }
 0x165   :  { %1009 = vadd.xlane.f32.xlu0 %v1008_v61  ;;  %v269_v61 = vmul.f32 %v2133_v13, %v2133_v13 }
 0x19a   :  { %v173_v57 = vpop.xlane.xlu1 %172 }
 0x19b   :  { %v174_v47 = vmul.f32 %v173_v57, %v2074_v18  ;;  %v1045_v57 = vmul.f32 %v2160_v32, %v2160_v32  ;;  %v459_v32 = vld [vmem:[%s2606_s7] sm:$0xff] }
 0x1a0   :  { %v442_v58 = vpop.xlane.xlu0 %441 }
 0x1a1   :  { %v443_v60 = vmul.f32 %v442_v58, %v2083_v31 }
 0x1a2   :  { %v407_v2 = vpop.xlane.xlu1 %406 }
 0x1a3   :  { %v408_v6 = vmul.f32 %v407_v2, %v2083_v31  ;;  %v453_v40 = vadd.f32 %v452_v3, %v443_v60  ;;  %v267_v2 = vadd.f32 %v266_v52, %v174_v47  ;;  %v658_v52 = vmul.f32 %v2178_v46, %v2178_v46 }
 0x1a5   :  { %v450_v8 = vadd.f32 %v449_v62, %v408_v6 }
 0x1a7   :  { %v454_v9 = vadd.f32 %v453_v40, %v450_v8 }
 0x1a9   :  { %v455_v10 = vmul.f32 0.5, %v454_v9 }
 0x1ab   :  { %v918_v14 = vpop.xlane.xlu2 %917  ;;  %v457_v16 = vsub.f32 %v455_v10, %v456_v36  ;;  %v2273_v36 = vmul.f32 0.5, %v2170_v39 }
 0x1ac   :  { %v928_v31 = vmul.f32 %v918_v14, %v2117_v59 }
 0x1ad   :  { %v462_v48 = vsel %vm458_vm8, %v457_v16, %v408_v6  ;;  %v493_v45 = vsel %vm458_vm8, %v457_v16, %v443_v60  ;;  %v273_v16 = vmul.f32 %v2141_v19, %v2141_v19 }
 0x1ae   :  { %v463_v21 = vadd.f32 1e-05, %v462_v48  ;;  %v494_v24 = vadd.f32 1e-05, %v493_v45  ;;  %v1036_v29 = vadd.f32 %v1032_v41, %v928_v31 }
 0x1b0   :  { %1471 = vrsqrt.f32 %v463_v21  ;;  %vm470_vm14 = vweird.f32 %v463_v21  ;;  %vm501_vm15 = vweird.f32 %v494_v24 }
 0x1b1   :  { %1473 = vrsqrt.f32 %v494_v24 }
 0x1b3   :  { %v1001_v42 = vpop.xlane.xlu2 %1000 }
 0x1b4   :  { %v1011_v27 = vmul.f32 %v1001_v42, %v2117_v59 }
 0x1b6   :  { %v1048_v33 = vadd.f32 %v1044_v53, %v1011_v27  ;;  %v1472_v34 = vpop.eup %1471 }
 0x1b7   :  { %v1474_v55 = vpop.eup %1473  ;;  %v465_v38 = vmul.f32 %v1472_v34, %v463_v21  ;;  %vm471_vm12 = vweird.f32 %v1472_v34 }
 0x1b8   :  { %v1052_v54 = vadd.f32 %v1048_v33, %v1036_v29  ;;  %v921_v0 = vpop.xlane.xlu0 %920  ;;  %v496_v49 = vmul.f32 %v1474_v55, %v494_v24  ;;  %vm502_vm13 = vweird.f32 %v1474_v55  ;;  %vm472_vm0 = vmor %vm470_vm14, %vm471_vm12  ;;  %v1061_v29 = vmul.f32 %v2273_v36, %v2273_v36  ;;  %v460_v24 = vld [vmem:[%s2607_s8] sm:$0xff] }
 0x1b9   :  { %v466_v51 = vmul.f32 %v1472_v34, %v465_v38  ;;  %v929_v8 = vmul.f32 %v921_v0, %v2117_v59  ;;  %vm503_vm1 = vmor %vm501_vm15, %vm502_vm13 }
 0x1ba   :  { %v1056_v4 = vmul.f32 0.5, %v1052_v54  ;;  %v497_v56 = vmul.f32 %v1474_v55, %v496_v49 }
 0x1bb   :  { %v254_v7 = vpop.xlane.xlu2 %253  ;;  %v467_v60 = vmul.f32 0.5, %v466_v51  ;;  %v1037_v31 = vadd.f32 %v1033_v23, %v929_v8  ;;  %v592_v42 = vpop.xlane.xlu1 %591 }
 0x1bc   :  { %v1064_v35 = vsub.f32 %v1056_v4, %v1060_v5  ;;  %v255_v58 = vmul.f32 %v254_v7, %v2074_v18  ;;  %v498_v3 = vmul.f32 0.5, %v497_v56  ;;  %v596_v54 = vmul.f32 %v592_v42, %v2162_v25 }
 0x1bd   :  { %v468_v40 = vsub.f32 1.5, %v467_v60 }
 0x1be   :  { %v2263_v62 = vadd.f32 1e-05, %v1064_v35  ;;  %v270_v6 = vadd.f32 %v269_v61, %v255_v58  ;;  %v499_v9 = vsub.f32 1.5, %v498_v3  ;;  %v2304_v61 = vmul.f32 0.5, %v2182_v50 }
 0x1bf   :  { %v469_v10 = vmul.f32 %v1472_v34, %v468_v40  ;;  %v660_v46 = vadd.f32 %v658_v52, %v596_v54 }
 0x1c0   :  { %1475 = vrsqrt.f32 %v2263_v62  ;;  %v271_v18 = vadd.f32 %v270_v6, %v267_v2  ;;  %v1004_v13 = vpop.xlane.xlu0 %1003  ;;  %v500_v26 = vmul.f32 %v1474_v55, %v499_v9  ;;  %v672_v23 = vmul.f32 %v2304_v61, %v2304_v61 }
 0x1c1   :  { %v1012_v14 = vmul.f32 %v1004_v13, %v2117_v59  ;;  %v473_v45 = vsel %vm472_vm0, %v1472_v34, %v469_v10  ;;  %vm1100_vm6 = vweird.f32 %v2263_v62 }
 0x1c2   :  { %v272_v48 = vmul.f32 0.5, %v271_v18  ;;  %v504_v53 = vsel %vm503_vm1, %v1474_v55, %v500_v26  ;;  %v474_v21 = vmul.f32 %v473_v45, %v459_v32  ;;  %v1074_v26 = vld [vmem:[%s2576_s22] sm:$0xff] }
 0x1c3   :  { %v1049_v41 = vadd.f32 %v1045_v57, %v1012_v14  ;;  %v505_v39 = vmul.f32 %v504_v53, %v459_v32  ;;  %v646_v0 = vpop.xlane.xlu2 %645 }
 0x1c4   :  { %v274_v27 = vsub.f32 %v272_v48, %v273_v16  ;;  %480 = vperm.xlu0 %1460, %v474_v21   ;;  %v475_v19 = vmul.f32 %v474_v21, %v2115_v12 }
 0x1c5   :  { %v1053_v33 = vadd.f32 %v1049_v41, %v1037_v31  ;;  %511 = vperm.xlu2 %1462, %v505_v39   ;;  %v506_v49 = vmul.f32 %v505_v39, %v2109_v11  ;;  %v648_v11 = vmul.f32 %v646_v0, %v2162_v25 }
 0x1c6   :  { %v1476_v38 = vpop.eup %1475  ;;  %v281_v34 = vsel %vm277_vm10, %v274_v27, %v174_v47  ;;  %v320_v55 = vsel %vm277_vm10, %v274_v27, %v255_v58  ;;  %v476_v2 = vsub.f32 %v460_v24, %v475_v19 }
 0x1c7   :  { %v1095_v5 = vmul.f32 %v1476_v38, %v2263_v62  ;;  %v2292_v51 = vadd.f32 1e-05, %v281_v34  ;;  %v2294_v4 = vadd.f32 1e-05, %v320_v55  ;;  %v1057_v12 = vmul.f32 0.5, %v1053_v33 }
 0x1c8   :  { %v643_v47 = vpop.xlane.xlu0 %642  ;;  %v507_v7 = vsub.f32 %v460_v24, %v506_v49  ;;  %v2310_v3 = vadd.f32 1e-05, %v648_v11  ;;  %vm1101_vm4 = vweird.f32 %v1476_v38  ;;  %v924_v31 = vpop.xlane.xlu1 %923  ;;  %v278_v11 = vld [vmem:[%s2608_s28] sm:$0xf] }
 0x1c9   :  { %1477 = vrsqrt.f32 %v2292_v51  ;;  %v1065_v56 = vsub.f32 %v1057_v12, %v1061_v29  ;;  %v647_v35 = vmul.f32 %v643_v47, %v2162_v25  ;;  %v1096_v58 = vmul.f32 %v1476_v38, %v1095_v5  ;;  %vm1102_vm7 = vmor %vm1100_vm6, %vm1101_vm4 }
 0x1ca   :  { %1479 = vrsqrt.f32 %v2294_v4  ;;  %517 = vperm.xlu1 %1461, %v507_v7   ;;  %vm289_vm10 = vweird.f32 %v2292_v51  ;;  %vm328_vm11 = vweird.f32 %v2294_v4 }
 0x1cb   :  { %v2307_v60 = vadd.f32 1e-05, %v1065_v56  ;;  %v666_v44 = vadd.f32 %v664_v1, %v647_v35  ;;  %v1097_v57 = vmul.f32 0.5, %v1096_v58  ;;  %v1007_v12 = vpop.xlane.xlu2 %1006 }
 0x1cc   :  { %486 = vperm.xlu0 %1460, %v476_v2  }
 0x1cd   :  { %1481 = vrsqrt.f32 %v2307_v60  ;;  %v668_v6 = vadd.f32 %v666_v44, %v660_v46  ;;  %v1098_v40 = vsub.f32 1.5, %v1097_v57  ;;  %v1075_v46 = vld [vmem:[%s2576_s22 + $0x8] sm:$0xff]  ;;  %vm1110_vm13 = vweird.f32 %v2307_v60 }
 0x1ce   :  { %1483 = vrsqrt.f32 %v2310_v3 }
 0x1cf   :  { %v2312_v50 = vpop.eup %1477  ;;  %v670_v8 = vmul.f32 0.5, %v668_v6  ;;  %v1099_v13 = vmul.f32 %v1476_v38, %v1098_v40 }
 0x1d0   :  { %v2316_v9 = vpop.eup %1479  ;;  %v595_v18 = vpop.xlane.xlu0 %594  ;;  %v284_v32 = vmul.f32 %v2312_v50, %v2292_v51  ;;  %vm290_vm8 = vweird.f32 %v2312_v50  ;;  %v1013_v51 = vmul.f32 %v1007_v12, %v2117_v59 }
 0x1d1   :  { %v323_v10 = vmul.f32 %v2316_v9, %v2294_v4  ;;  %v674_v14 = vsub.f32 %v670_v8, %v672_v23  ;;  %v597_v16 = vmul.f32 %v595_v18, %v2162_v25  ;;  %v1103_v48 = vsel %vm1102_vm7, %v1476_v38, %v1099_v13  ;;  %v1078_v25 = vld [vmem:[%s2577_s23] sm:$0xff]  ;;  %v927_v56 = vpop.xlane.xlu1 %926  ;;  %vm291_vm14 = vmor %vm289_vm10, %vm290_vm8 }
 0x1d2   :  { %v1134_v53 = vmul.f32 %v1103_v48, %v1074_v26  ;;  %v285_v21 = vmul.f32 %v2312_v50, %v284_v32  ;;  %v930_v38 = vmul.f32 %v924_v31, %v2117_v59  ;;  %vm329_vm12 = vweird.f32 %v2316_v9 }
 0x1d3   :  { %v1482_v45 = vpop.eup %1481  ;;  %v2328_v62 = vadd.f32 1e-05, %v674_v14  ;;  %v2331_v41 = vadd.f32 1e-05, %v597_v16  ;;  %v324_v27 = vmul.f32 %v2316_v9, %v323_v10  ;;  %v931_v40 = vmul.f32 %v927_v56, %v2117_v59  ;;  %vm330_vm0 = vmor %vm328_vm11, %vm329_vm12 }
 0x1d4   :  { %v1105_v42 = vmul.f32 %v1482_v45, %v2307_v60  ;;  %1276 = vperm.xlu2 %1462, %v1134_v53   ;;  %1152 = vperm.xlu1 %1461, %v1134_v53   ;;  %v1138_v39 = vmul.f32 %v1134_v53, %v2251_v28  ;;  %v2340_v29 = vpop.eup %1483  ;;  %v286_v19 = vmul.f32 0.5, %v285_v21  ;;  %vm1111_vm9 = vweird.f32 %v1482_v45 }
 0x1d5   :  { %1485 = vrsqrt.f32 %v2328_v62  ;;  %v325_v34 = vmul.f32 0.5, %v324_v27  ;;  %v762_v55 = vmul.f32 %v2340_v29, %v2310_v3  ;;  %v2352_v7 = vadd.f32 1e-05, %v930_v38  ;;  %vm1112_vm15 = vmor %vm1110_vm13, %vm1111_vm9 }
 0x1d6   :  { %1487 = vrsqrt.f32 %v2331_v41  ;;  %v1142_v33 = vsub.f32 %v1078_v25, %v1138_v39  ;;  %v1106_v24 = vmul.f32 %v1482_v45, %v1105_v42  ;;  %v287_v0 = vsub.f32 1.5, %v286_v19 }
 0x1d7   :  { %v326_v28 = vsub.f32 1.5, %v325_v34  ;;  %v763_v35 = vmul.f32 %v2340_v29, %v762_v55  ;;  %1489 = vrsqrt.f32 %v2352_v7  ;;  %v2383_v16 = vadd.f32 1e-05, %v1013_v51 }
 0x1d8   :  { %1300 = vperm.xlu0 %1460, %v1142_v33   ;;  %v1107_v54 = vmul.f32 0.5, %v1106_v24  ;;  %v288_v1 = vmul.f32 %v2312_v50, %v287_v0  ;;  %vm695_vm6 = vweird.f32 %v2328_v62  ;;  %vm705_vm7 = vweird.f32 %v2331_v41  ;;  %v1010_v21 = vpop.xlane.xlu0 %1009 }
 0x1d9   :  { %v327_v6 = vmul.f32 %v2316_v9, %v326_v28  ;;  %v764_v32 = vmul.f32 0.5, %v763_v35  ;;  %1491 = vrsqrt.f32 %v2383_v16  ;;  %vm768_vm10 = vweird.f32 %v2340_v29  ;;  %v682_v35 = vld [vmem:[%s2571_s17 + $0x8] sm:$0xff] }
 0x1da   :  { %v1108_v52 = vsub.f32 1.5, %v1107_v54  ;;  %v292_v2 = vsel %vm291_vm14, %v2312_v50, %v288_v1  ;;  %vm767_vm11 = vweird.f32 %v2310_v3  ;;  %vm1120_vm14 = vweird.f32 %v2352_v7 }
 0x1db   :  { %v2346_v49 = vpop.eup %1485  ;;  %v293_v18 = vmul.f32 %v292_v2, %v278_v11  ;;  %v331_v50 = vsel %vm330_vm0, %v2316_v9, %v327_v6  ;;  %v679_v9 = vld [vmem:[%s2570_s16] sm:$0xff]  ;;  %v765_v53 = vsub.f32 1.5, %v764_v32  ;;  %vm769_vm12 = vmor %vm767_vm11, %vm768_vm10 }
 0x1dc   :  { %v690_v5 = vmul.f32 %v2346_v49, %v2328_v62  ;;  %v1488_v47 = vpop.eup %1487  ;;  %1176 = vperm.xlu1 %1461, %v1142_v33   ;;  %v1109_v44 = vmul.f32 %v1482_v45, %v1108_v52  ;;  %v332_v14 = vmul.f32 %v331_v50, %v278_v11  ;;  %vm696_vm1 = vweird.f32 %v2346_v49 }
 0x1dd   :  { %v700_v58 = vmul.f32 %v1488_v47, %v2331_v41  ;;  %v2381_v26 = vmul.f32 %v293_v18, %v2151_v20  ;;  %vm706_vm4 = vweird.f32 %v1488_v47  ;;  %vm697_vm8 = vmor %vm695_vm6, %vm696_vm1  ;;  %v2398_v27 = vpop.eup %1489  ;;  %v1014_v41 = vmul.f32 %v1010_v21, %v2117_v59 }
 0x1de   :  { %v691_v57 = vmul.f32 %v2346_v49, %v690_v5  ;;  %v1113_v8 = vsel %vm1112_vm15, %v1482_v45, %v1109_v44  ;;  %v2387_v45 = vadd.f32 1e-05, %v931_v40  ;;  %v2395_v42 = vmul.f32 %v332_v14, %v2157_v30  ;;  %vm707_vm9 = vmor %vm705_vm7, %vm706_vm4  ;;  %v680_v30 = vld [vmem:[%s2570_s16 + $0x8] sm:$0xff]  ;;  %v681_v40 = vld [vmem:[%s2571_s17] sm:$0xff] }
 0x1df   :  { %v701_v23 = vmul.f32 %v1488_v47, %v700_v58  ;;  %v1135_v60 = vmul.f32 %v1113_v8, %v1075_v46  ;;  %v1115_v24 = vmul.f32 %v2398_v27, %v2352_v7  ;;  %v766_v19 = vmul.f32 %v2340_v29, %v765_v53  ;;  %v2413_v34 = vpop.eup %1491  ;;  %v1076_v8 = vld [vmem:[%s2576_s22 + $0x10] sm:$0xff]  ;;  %v1081_v53 = vld [vmem:[%s2577_s23 + $0x18] sm:$0xff] }
 0x1e0   :  { %v692_v13 = vmul.f32 0.5, %v691_v57  ;;  %1493 = vrsqrt.f32 %v2387_v45  ;;  %v2415_v55 = vadd.f32 1e-05, %v1014_v41  ;;  %vm1121_vm13 = vweird.f32 %v2398_v27 }
 0x1e1   :  { %v702_v10 = vmul.f32 0.5, %v701_v23  ;;  %1281 = vperm.xlu0 %1460, %v1135_v60   ;;  %1157 = vperm.xlu2 %1462, %v1135_v60   ;;  %v1139_v4 = vmul.f32 %v1135_v60, %v2273_v36  ;;  %v1116_v54 = vmul.f32 %v2398_v27, %v1115_v24  ;;  %v770_v0 = vsel %vm769_vm12, %v2340_v29, %v766_v19  ;;  %v279_v29 = vld [vmem:[%s2609_s11] sm:$0xf]  ;;  %vm1122_vm15 = vmor %vm1120_vm14, %vm1121_vm13 }
 0x1e2   :  { %v693_v48 = vsub.f32 1.5, %v692_v13  ;;  %1495 = vrsqrt.f32 %v2415_v55  ;;  %v295_v11 = vsub.f32 %v279_v29, %v2381_v26  ;;  %vm1245_vm0 = vweird.f32 %v2413_v34  ;;  %v508_v19 = vld [vmem:[#allocation4 + $0x8] sm:$0xff] }
 0x1e3   :  { %v703_v31 = vsub.f32 1.5, %v702_v10  ;;  %v1117_v3 = vmul.f32 0.5, %v1116_v54  ;;  %v334_v7 = vsub.f32 %v279_v29, %v2395_v42  ;;  %vm1244_vm4 = vweird.f32 %v2383_v16 }
 0x1e4   :  { %v694_v20 = vmul.f32 %v2346_v49, %v693_v48  ;;  %vm1246_vm6 = vmor %vm1244_vm4, %vm1245_vm0  ;;  %vm1130_vm7 = vweird.f32 %v2387_v45  ;;  %vm1254_vm10 = vweird.f32 %v2415_v55 }
 0x1e5   :  { %v704_v36 = vmul.f32 %v1488_v47, %v703_v31  ;;  %v1118_v1 = vsub.f32 1.5, %v1117_v3 }
 0x1e6   :  { %v698_v25 = vsel %vm697_vm8, %v2346_v49, %v694_v20  ;;  %v1494_v59 = vpop.eup %1493  ;;  %v1239_v49 = vmul.f32 %v2413_v34, %v2383_v16  ;;  %v1080_v16 = vld [vmem:[%s2577_s23 + $0x10] sm:$0xff] }
 0x1e7   :  { %v709_v39 = vmul.f32 %v698_v25, %v679_v9  ;;  %v708_v62 = vsel %vm707_vm9, %v1488_v47, %v704_v36  ;;  %v1125_v28 = vmul.f32 %v1494_v59, %v2387_v45  ;;  %v1079_v47 = vld [vmem:[%s2577_s23 + $0x8] sm:$0xff]  ;;  %v1119_v2 = vmul.f32 %v2398_v27, %v1118_v1  ;;  %s1578_s23 = smov [#allocation4]  }
 0x1e8   :  { %v710_v33 = vmul.f32 %v708_v62, %v680_v30  ;;  %v1240_v5 = vmul.f32 %v2413_v34, %v1239_v49  ;;  %v1496_v56 = vpop.eup %1495  ;;  %v1143_v44 = vsub.f32 %v1079_v47, %v1139_v4  ;;  %vm1131_vm1 = vweird.f32 %v1494_v59  ;;  %v1077_v4 = vld [vmem:[%s2576_s22 + $0x18] sm:$0xff]  ;;  %s1347_s18 = sshll.u32 %s1578_s23, 4  ;;  %v1146_v47 = vld [vmem:[%s2581_s27] sm:$0xff]  ;;  %s1362_s23 = sshll.u32 %s2580_s26, 4  ;;  %s1348_s18 = int_to_ptr.vmem [resolvable:$true] %s1347_s18  ;;  %s1363_s23 = int_to_ptr.hbm [resolvable:$true] %s1362_s23 }
 0x1e9   :  { %719 = vperm.xlu1 %1461, %v709_v39   ;;  %v711_v38 = vmul.f32 %v709_v39, %v2304_v61  ;;  %299 = vperm.xlu2 %1462, %v293_v18   ;;  %v2423_v61 = vmul.f32 %v770_v0, %v680_v30  ;;  %v1126_v12 = vmul.f32 %v1494_v59, %v1125_v28  ;;  %vm1132_vm8 = vmor %vm1130_vm7, %vm1131_vm1  ;;  %vm1255_vm9 = vweird.f32 %v1496_v56 }
 0x1ea   :  { %724 = vperm.xlu0 %1460, %v710_v33   ;;  %v712_v52 = vmul.f32 %v710_v33, %v2210_v22  ;;  %v1241_v58 = vmul.f32 0.5, %v1240_v5  ;;  %v1249_v22 = vmul.f32 %v1496_v56, %v2415_v55  ;;  %v1123_v18 = vsel %vm1122_vm15, %v2398_v27, %v1119_v2  ;;  %vm1256_vm11 = vmor %vm1254_vm10, %vm1255_vm9  ;;  %v477_v55 = vld [vmem:[#allocation4] sm:$0xff]  ;;  %v1425_v5 = vld [vmem:[%s2581_s27 + $0x20] sm:$0xff] }
 0x1eb   :  { %v1127_v46 = vmul.f32 0.5, %v1126_v12  ;;  %v713_v60 = vsub.f32 %v681_v40, %v711_v38  ;;  %v1136_v50 = vmul.f32 %v1123_v18, %v1076_v8  ;;  %v774_v21 = vmul.f32 %v2423_v61, %v2192_v63 }
 0x1ec   :  { %v714_v51 = vsub.f32 %v682_v35, %v712_v52  ;;  %v1242_v57 = vsub.f32 1.5, %v1241_v58  ;;  %v1250_v23 = vmul.f32 %v1496_v56, %v1249_v22  ;;  %v1581_v22 = vmov 839922192  }
 0x1ed   :  { %v1128_v6 = vsub.f32 1.5, %v1127_v46  ;;  %v1140_v48 = vmul.f32 %v1136_v50, %v2204_v17  ;;  %v776_v25 = vsub.f32 %v682_v35, %v774_v21  ;;  %v1147_v46 = vld [vmem:[%s2581_s27 + $0x8] sm:$0xff]  ;;  %v302_v2 = vunpack.c.l.s4 %v1581_v22 }
 0x1ee   :  { %v1243_v32 = vmul.f32 %v2413_v34, %v1242_v57  ;;  %v1251_v10 = vmul.f32 0.5, %v1250_v23  ;;  %v296_v21 = vld [vmem:[#allocation2] sm:$0xff] }
 0x1ef   :  { %v1129_v13 = vmul.f32 %v1494_v59, %v1128_v6  ;;  %v1144_v45 = vsub.f32 %v1080_v16, %v1140_v48  ;;  %v303_v23 = vunpack.c.0.s8 %v302_v2  ;;  %v715_v48 = vld [vmem:[#allocation6] sm:$0xff] }
 0x1f0   :  { %v1247_v26 = vsel %vm1246_vm6, %v2413_v34, %v1243_v32  ;;  %v1252_v31 = vsub.f32 1.5, %v1251_v10 }
 0x1f1   :  { %781 = vperm.xlu1 %1461, %v709_v39   ;;  %338 = vperm.xlu2 %1462, %v332_v14   ;;  %v1133_v14 = vsel %vm1132_vm8, %v1494_v59, %v1129_v13  ;;  %v1260_v9 = vmul.f32 %v1247_v26, %v1076_v8  ;;  %v335_v13 = vld [vmem:[#allocation2 + $0x8] sm:$0xff] }
 0x1f2   :  { %786 = vperm.xlu0 %1460, %v2423_v61   ;;  %v1137_v20 = vmul.f32 %v1133_v14, %v1077_v4  ;;  %v1253_v42 = vmul.f32 %v1496_v56, %v1252_v31 }
 0x1f4   :  { %v1141_v17 = vmul.f32 %v1137_v20, %v2219_v37  ;;  %v1257_v36 = vsel %vm1256_vm11, %v1496_v56, %v1253_v42  ;;  %v1264_v37 = vmul.f32 %v1260_v9, %v2201_v15 }
 0x1f5   :  { %v1261_v39 = vmul.f32 %v1257_v36, %v1077_v4 }
 0x1f6   :  { %v1145_v27 = vsub.f32 %v1081_v53, %v1141_v17  ;;  %v1268_v41 = vsub.f32 %v1080_v16, %v1264_v37  ;;  %v716_v17 = vld [vmem:[#allocation6 + $0x8] sm:$0xff] }
 0x1f7   :  { %v1265_v30 = vmul.f32 %v1261_v39, %v2225_v43 }
 0x1f9   :  { %309 = vperm.xlu1 %1461, %v295_v11   ;;  %1181 = vperm.xlu2 %1462, %v1143_v44   ;;  %v1269_v62 = vsub.f32 %v1081_v53, %v1265_v30  ;;  %v778_v53 = vld [vmem:[#allocation6 + $0x18] sm:$0xff] }
 0x1fa   :  { %736 = vperm.xlu0 %1460, %v714_v51  }
 0x201   :  { %793 = vperm.xlu1 %1461, %v713_v60   ;;  %348 = vperm.xlu2 %1462, %v334_v7  }
 0x202   :  { %1162 = vperm.xlu0 %1460, %v1136_v50  }
 0x209   :  { %1286 = vperm.xlu1 %1461, %v1260_v9   ;;  %731 = vperm.xlu2 %1462, %v713_v60  }
 0x20a   :  { %1186 = vperm.xlu0 %1460, %v1144_v45  }
 0x211   :  { %1191 = vperm.xlu1 %1461, %v1145_v27   ;;  %798 = vperm.xlu2 %1462, %v776_v25  }
 0x212   :  { %1167 = vperm.xlu0 %1460, %v1137_v20  }
 0x219   :  { %1305 = vperm.xlu1 %1461, %v1143_v44   ;;  %1291 = vperm.xlu2 %1462, %v1261_v39  }
 0x21a   :  { %1315 = vperm.xlu0 %1460, %v1269_v62  }
 0x21f   :  { %v512_v33 = vpop.permute.xlu2 %511 }
 0x220   :  { %v514_v38 = vmul.f32 %v512_v33, %v508_v19 }
 0x221   :  { %1310 = vperm.xlu2 %1462, %v1268_v41  }
 0x22e   :  { %v1277_v24 = vpop.permute.xlu2 %1276 }
 0x22f   :  { %v1294_v12 = vmul.f32 %v1425_v5, %v1277_v24 }
 0x236   :  { %v481_v63 = vpop.permute.xlu0 %480 }
 0x237   :  { %v483_v0 = vmul.f32 %v481_v63, %v477_v55 }
 0x23b   :  { %v1158_v59 = vpop.permute.xlu2 %1157 }
 0x23c   :  { %v518_v34 = vpop.permute.xlu1 %517  ;;  %v1171_v51 = vmul.f32 %v1158_v59, %v1147_v46 }
 0x23d   :  { %v520_v54 = vadd.f32 %v518_v34, %v514_v38  ;;  %v777_v34 = vld [vmem:[#allocation6 + $0x10] sm:$0xff] }
 0x23e   :  { %v487_v43 = vpop.permute.xlu0 %486 }
 0x23f   :  { %v521_v49 = vmax.f32 %v520_v54, 0.0  ;;  %v489_v15 = vadd.f32 %v487_v43, %v483_v0 }
 0x241   :  { %522 = vst.msk [vmem:[#allocation4 + $0x8] sm:$0xff] %vm391_vm3, %v521_v49  ;;  %v490_v28 = vmax.f32 %v489_v15, 0.0  ;;  %v1148_v15 = vld [vmem:[%s2581_s27 + $0x10] sm:$0xff] }
 0x243   :  { %491 = vst.msk [vmem:[#allocation4] sm:$0xff] %vm391_vm3, %v490_v28  ;;  %v300_v61 = vpop.permute.xlu2 %299 }
 0x244   :  { %1355 = dma.vmem_to_hbm [thread:$0]  %s1348_s18, 256, %s1350_s0, [#allocation5], %s1579_s29, %s1579_s29, %s1580_s5   ;;  %v304_v42 = vperm.slane %v300_v61, %v303_v23 }
 0x245   :  { %v1427_v61 = vld [vmem:[%s2581_s27 + $0x30] sm:$0xff] }
 0x246   :  { %v1153_v3 = vpop.permute.xlu1 %1152  ;;  %v306_v39 = vmul.f32 %v304_v42, %v296_v21 }
 0x247   :  { %v1170_v56 = vmul.f32 %v1153_v3, %v1146_v47 }
 0x24a   :  { %v1301_v29 = vpop.permute.xlu0 %1300 }
 0x24b   :  { %v1318_v52 = vadd.f32 %v1301_v29, %v1294_v12  ;;  %v339_v1 = vpop.permute.xlu2 %338 }
 0x24c   :  { %v343_v18 = vperm.slane %v339_v1, %v303_v23 }
 0x24d   :  { %v1322_v11 = vmax.f32 %v1318_v52, 0.0 }
 0x24e   :  { %v1177_v35 = vpop.permute.xlu1 %1176  ;;  %v345_v32 = vmul.f32 %v343_v18, %v335_v13 }
 0x24f   :  { %1429 = vst.msk [vmem:[%s2581_s27 + $0x20] sm:$0xff] %vm884_vm5, %v1322_v11  ;;  %v1194_v58 = vadd.f32 %v1177_v35, %v1170_v56  ;;  %v1149_v35 = vld [vmem:[%s2581_s27 + $0x18] sm:$0xff] }
 0x251   :  { %v1198_v44 = vmax.f32 %v1194_v58, 0.0 }
 0x253   :  { %1202 = vst.msk [vmem:[%s2581_s27] sm:$0xff] %vm884_vm5, %v1198_v44  ;;  %v1182_v57 = vpop.permute.xlu2 %1181  ;;  %v2496_v6 = vpop.permute.xlu0 %1281 }
 0x254   :  { %v1195_v40 = vadd.f32 %v1182_v57, %v1171_v51  ;;  %v1426_v51 = vld [vmem:[%s2581_s27 + $0x28] sm:$0xff]  ;;  %v1428_v57 = vld [vmem:[%s2581_s27 + $0x38] sm:$0xff] }
 0x255   :  { %v1295_v2 = vmul.f32 %v1426_v51, %v2496_v6 }
 0x256   :  { %v1199_v8 = vmax.f32 %v1195_v40, 0.0 }
 0x258   :  { %1203 = vst.msk [vmem:[%s2581_s27 + $0x8] sm:$0xff] %vm884_vm5, %v1199_v8 }
 0x25b   :  { %v720_v60 = vpop.permute.xlu1 %719  ;;  %v349_v7 = vpop.permute.xlu2 %348 }
 0x25c   :  { %v725_v50 = vpop.permute.xlu0 %724  ;;  %v353_v10 = vperm.slane %v349_v7, %v303_v23  ;;  %v727_v4 = vmul.f32 %v720_v60, %v715_v48 }
 0x25d   :  { %v728_v36 = vmul.f32 %v725_v50, %v716_v17 }
 0x25e   :  { %v355_v14 = vadd.f32 %v353_v10, %v345_v32 }
 0x260   :  { %v356_v26 = vmax.f32 %v355_v14, 0.0 }
 0x262   :  { %357 = vst [vmem:[#allocation2 + $0x8] sm:$0xff] %v356_v26 }
 0x263   :  { %v782_v31 = vpop.permute.xlu1 %781  ;;  %v732_v16 = vpop.permute.xlu2 %731 }
 0x264   :  { %v787_v9 = vpop.permute.xlu0 %786  ;;  %v739_v20 = vadd.f32 %v732_v16, %v727_v4  ;;  %v789_v55 = vmul.f32 %v782_v31, %v777_v34 }
 0x265   :  { %v790_v27 = vmul.f32 %v787_v9, %v778_v53 }
 0x266   :  { %v741_v45 = vmax.f32 %v739_v20, 0.0 }
 0x268   :  { %743 = vst.msk [vmem:[#allocation6] sm:$0xff] %vm367_vm2, %v741_v45 }
 0x26b   :  { %v310_v25 = vpop.permute.xlu1 %309  ;;  %v799_v62 = vpop.permute.xlu2 %798 }
 0x26c   :  { %v314_v30 = vperm.slane %v310_v25, %v303_v23  ;;  %v737_v37 = vpop.permute.xlu0 %736  ;;  %v802_v41 = vadd.f32 %v799_v62, %v790_v27 }
 0x26d   :  { %v740_v33 = vadd.f32 %v737_v37, %v728_v36 }
 0x26e   :  { %v316_v24 = vadd.f32 %v314_v30, %v306_v39  ;;  %v804_v63 = vmax.f32 %v802_v41, 0.0 }
 0x26f   :  { %v742_v19 = vmax.f32 %v740_v33, 0.0 }
 0x270   :  { %v317_v38 = vmax.f32 %v316_v24, 0.0  ;;  %806 = vst.msk [vmem:[#allocation6 + $0x18] sm:$0xff] %vm367_vm2, %v804_v63 }
 0x271   :  { %744 = vst.msk [vmem:[#allocation6 + $0x8] sm:$0xff] %vm367_vm2, %v742_v19 }
 0x272   :  { %318 = vst [vmem:[#allocation2] sm:$0xff] %v317_v38 }
 0x273   :  { %v794_v59 = vpop.permute.xlu1 %793  ;;  %1342 = dma.vmem_to_hbm [thread:$0]  %s1335_s14, 256, %s1337_s10, [#allocation3], %s1579_s29, %s1579_s29, %s1580_s5   ;;  %v1292_v0 = vpop.permute.xlu2 %1291 }
 0x274   :  { %v801_v54 = vadd.f32 %v794_v59, %v789_v55  ;;  %v1163_v49 = vpop.permute.xlu0 %1162  ;;  %v1297_v40 = vmul.f32 %v1428_v57, %v1292_v0 }
 0x275   :  { %v1172_v28 = vmul.f32 %v1163_v49, %v1148_v15 }
 0x276   :  { %v803_v43 = vmax.f32 %v801_v54, 0.0 }
 0x278   :  { %805 = vst.msk [vmem:[#allocation6 + $0x10] sm:$0xff] %vm367_vm2, %v803_v43 }
 0x279   :  { %1368 = dma.vmem_to_hbm [thread:$0]  %s1361_s30, 512, %s1363_s23, [#allocation5], %s1579_s29, %s1579_s29, %s1580_s5  }
 0x27b   :  { %v1287_v3 = vpop.permute.xlu1 %1286  ;;  %v1311_v29 = vpop.permute.xlu2 %1310 }
 0x27c   :  { %v1296_v5 = vmul.f32 %v1427_v61, %v1287_v3  ;;  %v1187_v12 = vpop.permute.xlu0 %1186 }
 0x27d   :  { %v1196_v52 = vadd.f32 %v1187_v12, %v1172_v28 }
 0x27e   :  { %v1320_v1 = vadd.f32 %v1311_v29, %v1296_v5 }
 0x27f   :  { %v1200_v47 = vmax.f32 %v1196_v52, 0.0 }
 0x280   :  { %v1324_v56 = vmax.f32 %v1320_v1, 0.0 }
 0x281   :  { %1204 = vst.msk [vmem:[%s2581_s27 + $0x10] sm:$0xff] %vm884_vm5, %v1200_v47 }
 0x282   :  { %1431 = vst.msk [vmem:[%s2581_s27 + $0x30] sm:$0xff] %vm884_vm5, %v1324_v56 }
 0x283   :  { %v1192_v11 = vpop.permute.xlu1 %1191 }
 0x284   :  { %v1168_v58 = vpop.permute.xlu0 %1167 }
 0x285   :  { %v1173_v46 = vmul.f32 %v1168_v58, %v1149_v35 }
 0x287   :  { %v1197_v44 = vadd.f32 %v1192_v11, %v1173_v46 }
 0x289   :  { %v1201_v22 = vmax.f32 %v1197_v44, 0.0 }
 0x28b   :  { %1205 = vst.msk [vmem:[%s2581_s27 + $0x18] sm:$0xff] %vm884_vm5, %v1201_v22  ;;  %v1306_v23 = vpop.permute.xlu1 %1305 }
 0x28c   :  { %v1319_v8 = vadd.f32 %v1306_v23, %v1295_v2  ;;  %v1316_v18 = vpop.permute.xlu0 %1315 }
 0x28d   :  { %v1321_v60 = vadd.f32 %v1316_v18, %v1297_v40 }
 0x28e   :  { %v1323_v13 = vmax.f32 %v1319_v8, 0.0 }
 0x28f   :  { %v1325_v7 = vmax.f32 %v1321_v60, 0.0 }
 0x290   :  { %1430 = vst.msk [vmem:[%s2581_s27 + $0x28] sm:$0xff] %vm884_vm5, %v1323_v13 }
 0x291   :  { %1432 = vst.msk [vmem:[%s2581_s27 + $0x38] sm:$0xff] %vm884_vm5, %v1325_v7 }
 0x292   :  { %1569 = dma.done.wait [#allocation3], 256  }
 0x293   :  { %1570 = vsyncadd [#allocation3], 4294967040 }
 0x294   :  { %1571 = dma.done.wait [#allocation5], 768  }
 0x295   :  { %1572 = vsyncadd [#allocation5], 4294966528 }
 0x296   :  { %1385 = vsyncpa [#allocation3], 1 }
 0x297   :  { %1386 = vsyncpa [#allocation5], 1 }

</bundles_post_ra>
